<compile_context>
chip_gen: v5e
topology: v5e:2x2
jax: 0.10.0
libtpu: 0.0.40
codegen_flags: <defaults>
</compile_context>

<pallas_src>
import functools
import math

import jax
import jax.numpy as jnp
from jax.experimental import pallas as pl
from jax.experimental.pallas import tpu as pltpu

_F32 = jnp.float32
_BF16 = jnp.bfloat16
_HEAD_PAD = 128  # lane-dense packed head slab width
_VMEM = pl.BlockSpec(memory_space=pltpu.MemorySpace.VMEM)
_ANY = pl.BlockSpec(memory_space=pl.ANY)


# ---------------------------------------------------------------------------
# Fused Pallas kernel: pos-encoder MLP + inv MLP + spec MLP
# ---------------------------------------------------------------------------
def _fused_kernel(x_ref, coord_ref, pw1_ref, w1x_ref, w1p_ref,
                  wearly_ref, bias_ref, wlate_hbm_ref,
                  out_ref,
                  wlate_vmem, dma_sem,
                  *, hidden, pos_dim, head_pad):
    f32 = jnp.float32
    bf16 = jnp.bfloat16

    # Kick off the late-layer (L3 + heads) weight DMA immediately; it lands
    # under the pos-encoder / L1 / L2 dependency chain.
    late_cp = pltpu.make_async_copy(wlate_hbm_ref, wlate_vmem, dma_sem)
    late_cp.start()

    # ---- bias-slab column offsets (all multiples of 128 -> aligned) -------
    b_pb1 = 0
    b_pbo = b_pb1 + hidden
    b_b1 = b_pbo + pos_dim
    b_b2i = b_b1 + 2 * hidden
    b_b2s = b_b2i + hidden
    b_b3i = b_b2s + hidden
    b_b3s = b_b3i + hidden
    b_bo = b_b3s + hidden

    # ---- output-slab column offsets ----------------------------------------
    o_pos = 0
    o_e1 = o_pos + pos_dim            # e1 = [e1_inv | e1_spec], width 2*hidden
    o_e2i = o_e1 + 2 * hidden
    o_e2s = o_e2i + hidden
    o_e3i = o_e2s + hidden
    o_e3s = o_e3i + hidden
    o_head = o_e3s + hidden

    # ---- pos encoder: Linear -> BN(folded) -> ReLU -> Linear -> sigmoid ----
    # (K=4 layer-1 weight is tiny, kept f32; only ~4 KiB of traffic)
    h = jnp.maximum(
        jnp.dot(coord_ref[...], pw1_ref[...], preferred_element_type=f32)
        + bias_ref[:, b_pb1:b_pb1 + hidden], 0.0)
    pos = jax.nn.sigmoid(
        jnp.dot(h.astype(bf16), wearly_ref[:, 0:pos_dim],
                preferred_element_type=f32)
        + bias_ref[:, b_pbo:b_pbo + pos_dim])
    out_ref[:, o_pos:o_pos + pos_dim] = pos

    # ---- layer 1 of inv & spec, fused along N (one 2*hidden-wide result) ---
    # x_cat @ w1 == x @ w1[:x_dim] + pos @ w1[x_dim:]   (no concat needed)
    e1 = jnp.maximum(
        jnp.dot(x_ref[...], w1x_ref[...], preferred_element_type=f32)
        + jnp.dot(pos.astype(bf16), w1p_ref[...], preferred_element_type=f32)
        + bias_ref[:, b_b1:b_b1 + 2 * hidden], 0.0)
    out_ref[:, o_e1:o_e1 + 2 * hidden] = e1      # single store: [e1_inv|e1_spec]
    e1_bf = e1.astype(bf16)
    e1i = e1_bf[:, :hidden]
    e1s = e1_bf[:, hidden:]

    # ---- layer 2: two independent chains interleave on the MXU ------------
    w2i = wearly_ref[:, pos_dim:pos_dim + hidden]
    w2s = wearly_ref[:, pos_dim + hidden:pos_dim + 2 * hidden]
    e2i = jnp.maximum(jnp.dot(e1i, w2i, preferred_element_type=f32)
                      + bias_ref[:, b_b2i:b_b2i + hidden], 0.0)
    e2s = jnp.maximum(jnp.dot(e1s, w2s, preferred_element_type=f32)
                      + bias_ref[:, b_b2s:b_b2s + hidden], 0.0)
    out_ref[:, o_e2i:o_e2i + hidden] = e2i
    out_ref[:, o_e2s:o_e2s + hidden] = e2s

    # Late-layer weights must be resident from here on.
    late_cp.wait()

    # ---- layer 3 + both heads ----------------------------------------------
    w3i = wlate_vmem[:, 0:hidden]
    w3s = wlate_vmem[:, hidden:2 * hidden]
    woi = wlate_vmem[:, 2 * hidden:2 * hidden + head_pad]
    wos = wlate_vmem[:, 2 * hidden + head_pad:2 * hidden + 2 * head_pad]

    e3i = jnp.maximum(
        jnp.dot(e2i.astype(bf16), w3i, preferred_element_type=f32)
        + bias_ref[:, b_b3i:b_b3i + hidden], 0.0)
    e3s = jnp.maximum(
        jnp.dot(e2s.astype(bf16), w3s, preferred_element_type=f32)
        + bias_ref[:, b_b3s:b_b3s + hidden], 0.0)
    out_ref[:, o_e3i:o_e3i + hidden] = e3i
    out_ref[:, o_e3s:o_e3s + hidden] = e3s

    # Both tiny heads block-placed into one lane-dense head_pad-wide slab.
    out_ref[:, o_head:o_head + head_pad] = (
        jnp.dot(e3i.astype(bf16), woi, preferred_element_type=f32)
        + jnp.dot(e3s.astype(bf16), wos, preferred_element_type=f32)
        + bias_ref[:, b_bo:b_bo + head_pad])


# ---------------------------------------------------------------------------
# pallas_call wrapper (full forward, mirrors MLPDisentanglePos.forward)
# ---------------------------------------------------------------------------
def mlp_disentangle_pos_forward(x, coord, packed, *, num_classes, num_domains):
    b = x.shape[0]
    hidden = packed["wlate"].shape[0]
    head_pad = (packed["wlate"].shape[1] - 2 * hidden) // 2
    pos_dim = packed["wearly"].shape[1] - 2 * hidden
    assert hidden % 128 == 0 and pos_dim % 128 == 0, "lane-slice alignment"
    assert num_classes + num_domains <= head_pad

    out_w = pos_dim + 6 * hidden + head_pad   # one lane-dense output slab

    kernel = functools.partial(_fused_kernel, hidden=hidden, pos_dim=pos_dim,
                               head_pad=head_pad)

    slab = pl.pallas_call(
        kernel,
        out_shape=jax.ShapeDtypeStruct((b, out_w), _F32),
        in_specs=[_VMEM] * 7 + [_ANY],          # wlate stays in HBM (manual DMA)
        out_specs=_VMEM,
        scratch_shapes=[
            pltpu.VMEM((hidden, 2 * hidden + 2 * head_pad), _BF16),
            pltpu.SemaphoreType.DMA(()),
        ],
        compiler_params=pltpu.CompilerParams(
            vmem_limit_bytes=16 * 1024 * 1024),
        cost_estimate=pl.CostEstimate(
            flops=7_000_000, transcendentals=1024, bytes_accessed=1_000_000),
    )(x, coord,
      packed["pw1"], packed["w1x"], packed["w1p"],
      packed["wearly"], packed["bias"], packed["wlate"])

    # Slice the lane-dense slab back into the 9 module outputs.
    pos = slab[:, :pos_dim]
    o = pos_dim
    e1i = slab[:, o:o + hidden]; o += hidden
    e1s = slab[:, o:o + hidden]; o += hidden
    e2i = slab[:, o:o + hidden]; o += hidden
    e2s = slab[:, o:o + hidden]; o += hidden
    e3i = slab[:, o:o + hidden]; o += hidden
    e3s = slab[:, o:o + hidden]; o += hidden
    head = slab[:, o:o + head_pad]
    classif = head[:, :num_classes]
    classif_spec = head[:, num_classes:num_classes + num_domains]
    # (classif, inv_emb, spec_emb, classif_spec,
    #  inv_emb_n1, spec_emb_n1, inv_fc_feat, spec_fc_feat, pos_enc)
    return (classif, e1i, e1s, classif_spec, e2i, e2s, e3i, e3s, pos)


# ---------------------------------------------------------------------------
# Parameter construction (deterministic, synthetic) and host-side packing
# ---------------------------------------------------------------------------
def _init_linear(key, d_in, d_out):
    kw, kb = jax.random.split(key)
    bound = 1.0 / math.sqrt(d_in)
    w = jax.random.uniform(kw, (d_in, d_out), _F32, -bound, bound)
    b = jax.random.uniform(kb, (d_out,), _F32, -bound, bound)
    return w, b


def _init_bn(key, d):
    kg, kb, km, kv = jax.random.split(key, 4)
    gamma = 1.0 + 0.1 * jax.random.normal(kg, (d,), _F32)
    beta = 0.1 * jax.random.normal(kb, (d,), _F32)
    mean = 0.1 * jax.random.normal(km, (d,), _F32)
    var = 1.0 + 0.1 * jax.random.uniform(kv, (d,), _F32)
    return gamma, beta, mean, var


def init_raw_params(key, x_dim, coord_dim, hidden_dim=256, pos_enc_dim=128,
                    num_classes=8, num_domains=2):
    keys = iter(jax.random.split(key, 32))

    def lin_bn(d_in, d_out):
        w, b = _init_linear(next(keys), d_in, d_out)
        g, be, m, v = _init_bn(next(keys), d_out)
        return (w, b, g, be, m, v)

    cat_dim = x_dim + pos_enc_dim
    return {
        "pos": {"layers": [lin_bn(coord_dim, hidden_dim)],
                "out": _init_linear(next(keys), hidden_dim, pos_enc_dim)},
        "inv": {"layers": [lin_bn(cat_dim, hidden_dim),
                           lin_bn(hidden_dim, hidden_dim),
                           lin_bn(hidden_dim, hidden_dim)],
                "out": _init_linear(next(keys), hidden_dim, num_classes)},
        "spec": {"layers": [lin_bn(cat_dim, hidden_dim),
                            lin_bn(hidden_dim, hidden_dim),
                            lin_bn(hidden_dim, hidden_dim)],
                 "out": _init_linear(next(keys), hidden_dim, num_domains)},
    }


def _fold(w, b, gamma, beta, mean, var, eps=1e-5):
    """Fold eval-mode BatchNorm1d into the preceding Linear."""
    scale = gamma / jnp.sqrt(var + eps)
    return w * scale[None, :], ((b - mean) * scale + beta)[None, :]


def pack_params(raw, x_dim, num_classes, num_domains, head_pad=_HEAD_PAD):
    assert num_classes + num_domains <= head_pad

    # pos encoder (BN folded into its layer-1 weights)
    pw1, pb1 = _fold(*raw["pos"]["layers"][0])
    pwo_raw, pbo_raw = raw["pos"]["out"]
    pbo = pbo_raw[None, :]
    hidden = pwo_raw.shape[0]
    pos_dim = pwo_raw.shape[1]
    assert hidden % 128 == 0 and pos_dim % 128 == 0

    # inv/spec layer 1: fold BN, concat along N, split along K (x | pos parts)
    wi1, bi1 = _fold(*raw["inv"]["layers"][0])
    ws1, bs1 = _fold(*raw["spec"]["layers"][0])
    w1x = jnp.concatenate([wi1[:x_dim], ws1[:x_dim]], axis=1)
    w1p = jnp.concatenate([wi1[x_dim:], ws1[x_dim:]], axis=1)
    b1 = jnp.concatenate([bi1, bs1], axis=1)

    w2i, b2i = _fold(*raw["inv"]["layers"][1])
    w2s, b2s = _fold(*raw["spec"]["layers"][1])
    w3i, b3i = _fold(*raw["inv"]["layers"][2])
    w3s, b3s = _fold(*raw["spec"]["layers"][2])

    # heads block-placed into a lane-dense head_pad-wide slab
    woi_raw, boi = raw["inv"]["out"]
    wos_raw, bos = raw["spec"]["out"]
    woi = jnp.zeros((hidden, head_pad), _F32).at[:, :num_classes].set(woi_raw)
    wos = jnp.zeros((hidden, head_pad), _F32).at[
        :, num_classes:num_classes + num_domains].set(wos_raw)
    bo = (jnp.zeros((1, head_pad), _F32)
          .at[0, :num_classes].set(boi)
          .at[0, num_classes:num_classes + num_domains].set(bos))

    # K=hidden weights packed into two contiguous bf16 slabs (one DMA each);
    # wearly is consumed early, wlate is the manually-prefetched tail.
    wearly = jnp.concatenate([pwo_raw, w2i, w2s], axis=1).astype(_BF16)
    wlate = jnp.concatenate([w3i, w3s, woi, wos], axis=1).astype(_BF16)

    # all biases in one f32 slab; every offset is a multiple of 128
    bias = jnp.concatenate([pb1, pbo, b1, b2i, b2s, b3i, b3s, bo], axis=1)

    return dict(pw1=pw1,                       # f32 (tiny)
                w1x=w1x,                       # f32 (tiny)
                w1p=w1p.astype(_BF16),         # bf16
                wearly=wearly, wlate=wlate,    # bf16 slabs
                bias=bias)                     # f32


# ---------------------------------------------------------------------------
# Pure-JAX reference (unfused, eval-mode, f32), for correctness checking
# ---------------------------------------------------------------------------
def _ref_mlp(h, branch, act_out=False, eps=1e-5):
    inter = []
    for (w, b, gamma, beta, mean, var) in branch["layers"]:
        y = h @ w + b
        y = (y - mean) / jnp.sqrt(var + eps) * gamma + beta
        h = jnp.maximum(y, 0.0)
        inter.append(h)
    ow, ob = branch["out"]
    out = h @ ow + ob
    if act_out:
        out = jax.nn.sigmoid(out)
    return (out, *inter)


def reference_forward(x, coord, raw):
    pos = _ref_mlp(coord, raw["pos"], act_out=True)[0]
    xc = jnp.concatenate((x, pos), axis=1)
    classif, i1, i2, i3 = _ref_mlp(xc, raw["inv"])
    classif_s, s1, s2, s3 = _ref_mlp(xc, raw["spec"])
    return (classif, i1, s1, classif_s, i2, s2, i3, s3, pos)


# ---------------------------------------------------------------------------
if __name__ == "__main__":
    B, X_DIM, COORD_DIM = 8, 16, 4
    HIDDEN, POS_DIM, N_CLASSES, N_DOMAINS = 256, 128, 8, 2

    key = jax.random.PRNGKey(0)
    k_x, k_c, k_p = jax.random.split(key, 3)
    x = jax.random.normal(k_x, (B, X_DIM), _F32)
    coord = jax.random.uniform(k_c, (B, COORD_DIM), _F32)

    raw = init_raw_params(k_p, X_DIM, COORD_DIM, HIDDEN, POS_DIM,
                          N_CLASSES, N_DOMAINS)
    packed = pack_params(raw, X_DIM, N_CLASSES, N_DOMAINS)

    fwd = jax.jit(functools.partial(mlp_disentangle_pos_forward,
                                    num_classes=N_CLASSES,
                                    num_domains=N_DOMAINS))
    outs = jax.block_until_ready(fwd(x, coord, packed))

    expected_shapes = [
        (B, N_CLASSES), (B, HIDDEN), (B, HIDDEN), (B, N_DOMAINS),
        (B, HIDDEN), (B, HIDDEN), (B, HIDDEN), (B, HIDDEN), (B, POS_DIM),
    ]
    assert [tuple(o.shape) for o in outs] == expected_shapes
    assert all(bool(jnp.all(jnp.isfinite(o))) for o in outs)

    ref = jax.block_until_ready(reference_forward(x, coord, raw))
    # bf16 weights on the MXU operands, f32 accumulation -> 5e-2 tolerance.
    for got, want in zip(outs, ref):
        assert bool(jnp.allclose(got, want, rtol=5e-2, atol=5e-2)), \
            "mismatch vs pure-JAX reference"

    print("KERNEL_OK")
</pallas_src>

<mosaic_0001>
module attributes {stable_mosaic.version = 11 : i64} {
  func.func @_fused_kernel(%arg0: memref<8x16xf32, #tpu.memory_space<vmem>>, %arg1: memref<8x4xf32, #tpu.memory_space<vmem>>, %arg2: memref<4x256xf32, #tpu.memory_space<vmem>>, %arg3: memref<16x512xf32, #tpu.memory_space<vmem>>, %arg4: memref<128x512xbf16, #tpu.memory_space<vmem>>, %arg5: memref<256x640xbf16, #tpu.memory_space<vmem>>, %arg6: memref<1x2048xf32, #tpu.memory_space<vmem>>, %arg7: memref<256x768xbf16, #tpu.memory_space<any>>, %arg8: memref<8x1792xf32, #tpu.memory_space<vmem>>, %arg9: memref<256x768xbf16, #tpu.memory_space<vmem>>, %arg10: memref<!tpu.dma_semaphore, #tpu.memory_space<semaphore_mem>>) attributes {dimension_semantics = [], scalar_prefetch = 0 : i64, scratch_operands = 2 : i64, tpu.core_type = #tpu.core_type<tc>} {
    tpu.enqueue_dma source(%arg7 : memref<256x768xbf16, #tpu.memory_space<any>>) target(%arg9 : memref<256x768xbf16, #tpu.memory_space<vmem>>) target_semaphore(%arg10 : memref<!tpu.dma_semaphore, #tpu.memory_space<semaphore_mem>>)
    %c0 = arith.constant 0 : index
    %c0_0 = arith.constant 0 : index
    %0 = vector.load %arg1[%c0, %c0_0] : memref<8x4xf32, #tpu.memory_space<vmem>>, vector<8x4xf32>
    %c0_1 = arith.constant 0 : index
    %c0_2 = arith.constant 0 : index
    %1 = vector.load %arg2[%c0_1, %c0_2] : memref<4x256xf32, #tpu.memory_space<vmem>>, vector<4x256xf32>
    %cst = arith.constant dense<0.000000e+00> : vector<8x256xf32>
    %2 = tpu.matmul %0, %1, %cst {dimension_numbers = #tpu.dot_dimension_numbers<[1], [0], [0], [1], [0, 0, 1, 1], [], []>} : vector<8x4xf32>, vector<4x256xf32>, vector<8x256xf32> -> vector<8x256xf32>
    %c0_3 = arith.constant 0 : index
    %c0_4 = arith.constant 0 : index
    %3 = vector.load %arg6[%c0_3, %c0_4] : memref<1x2048xf32, #tpu.memory_space<vmem>>, vector<1x256xf32>
    %4 = vector.broadcast %3 : vector<1x256xf32> to vector<8x256xf32>
    %5 = arith.addf %2, %4 : vector<8x256xf32>
    %cst_5 = arith.constant 0.000000e+00 : f32
    %6 = vector.broadcast %cst_5 : f32 to vector<8x256xf32>
    %7 = arith.maximumf %5, %6 : vector<8x256xf32>
    %8 = arith.truncf %7 : vector<8x256xf32> to vector<8x256xbf16>
    %c0_6 = arith.constant 0 : index
    %c0_7 = arith.constant 0 : index
    %9 = vector.load %arg5[%c0_6, %c0_7] : memref<256x640xbf16, #tpu.memory_space<vmem>>, vector<256x128xbf16>
    %cst_8 = arith.constant dense<0.000000e+00> : vector<8x128xf32>
    %10 = tpu.matmul %8, %9, %cst_8 {dimension_numbers = #tpu.dot_dimension_numbers<[1], [0], [0], [1], [0, 0, 1, 1], [], []>} : vector<8x256xbf16>, vector<256x128xbf16>, vector<8x128xf32> -> vector<8x128xf32>
    %c0_9 = arith.constant 0 : index
    %c256 = arith.constant 256 : index
    %11 = vector.load %arg6[%c0_9, %c256] : memref<1x2048xf32, #tpu.memory_space<vmem>>, vector<1x128xf32>
    %12 = vector.broadcast %11 : vector<1x128xf32> to vector<8x128xf32>
    %13 = arith.addf %10, %12 : vector<8x128xf32>
    %14 = arith.negf %13 : vector<8x128xf32>
    %15 = math.exp %14 : vector<8x128xf32>
    %cst_10 = arith.constant 1.000000e+00 : f32
    %16 = vector.broadcast %cst_10 : f32 to vector<8x128xf32>
    %17 = arith.addf %16, %15 : vector<8x128xf32>
    %18 = arith.divf %16, %17 : vector<8x128xf32>
    %c0_11 = arith.constant 0 : index
    %c0_12 = arith.constant 0 : index
    %19 = vector.load %arg8[%c0_11, %c0_12] : memref<8x1792xf32, #tpu.memory_space<vmem>>, vector<8x128xf32>
    tpu.vector_store %arg8[%c0_11, %c0_12], %18 {strides = array<i32>} : memref<8x1792xf32, #tpu.memory_space<vmem>>, vector<8x128xf32>,
    %c0_13 = arith.constant 0 : index
    %c0_14 = arith.constant 0 : index
    %20 = vector.load %arg0[%c0_13, %c0_14] : memref<8x16xf32, #tpu.memory_space<vmem>>, vector<8x16xf32>
    %c0_15 = arith.constant 0 : index
    %c0_16 = arith.constant 0 : index
    %21 = vector.load %arg3[%c0_15, %c0_16] : memref<16x512xf32, #tpu.memory_space<vmem>>, vector<16x512xf32>
    %cst_17 = arith.constant dense<0.000000e+00> : vector<8x512xf32>
    %22 = tpu.matmul %20, %21, %cst_17 {dimension_numbers = #tpu.dot_dimension_numbers<[1], [0], [0], [1], [0, 0, 1, 1], [], []>} : vector<8x16xf32>, vector<16x512xf32>, vector<8x512xf32> -> vector<8x512xf32>
    %23 = arith.truncf %18 : vector<8x128xf32> to vector<8x128xbf16>
    %c0_18 = arith.constant 0 : index
    %c0_19 = arith.constant 0 : index
    %24 = vector.load %arg4[%c0_18, %c0_19] : memref<128x512xbf16, #tpu.memory_space<vmem>>, vector<128x512xbf16>
    %cst_20 = arith.constant dense<0.000000e+00> : vector<8x512xf32>
    %25 = tpu.matmul %23, %24, %cst_20 {dimension_numbers = #tpu.dot_dimension_numbers<[1], [0], [0], [1], [0, 0, 1, 1], [], []>} : vector<8x128xbf16>, vector<128x512xbf16>, vector<8x512xf32> -> vector<8x512xf32>
    %26 = arith.addf %22, %25 : vector<8x512xf32>
    %c0_21 = arith.constant 0 : index
    %c384 = arith.constant 384 : index
    %27 = vector.load %arg6[%c0_21, %c384] : memref<1x2048xf32, #tpu.memory_space<vmem>>, vector<1x512xf32>
    %28 = vector.broadcast %27 : vector<1x512xf32> to vector<8x512xf32>
    %29 = arith.addf %26, %28 : vector<8x512xf32>
    %cst_22 = arith.constant 0.000000e+00 : f32
    %30 = vector.broadcast %cst_22 : f32 to vector<8x512xf32>
    %31 = arith.maximumf %29, %30 : vector<8x512xf32>
    %c0_23 = arith.constant 0 : index
    %c128 = arith.constant 128 : index
    %32 = vector.load %arg8[%c0_23, %c128] : memref<8x1792xf32, #tpu.memory_space<vmem>>, vector<8x512xf32>
    tpu.vector_store %arg8[%c0_23, %c128], %31 {strides = array<i32>} : memref<8x1792xf32, #tpu.memory_space<vmem>>, vector<8x512xf32>,
    %33 = arith.truncf %31 : vector<8x512xf32> to vector<8x512xbf16>
    %34 = vector.extract_strided_slice %33 {offsets = [0, 0], sizes = [8, 256], strides = [1, 1]} : vector<8x512xbf16> to vector<8x256xbf16>
    %35 = vector.extract_strided_slice %33 {offsets = [0, 256], sizes = [8, 256], strides = [1, 1]} : vector<8x512xbf16> to vector<8x256xbf16>
    %c0_24 = arith.constant 0 : index
    %c128_25 = arith.constant 128 : index
    %36 = vector.load %arg5[%c0_24, %c128_25] : memref<256x640xbf16, #tpu.memory_space<vmem>>, vector<256x256xbf16>
    %c0_26 = arith.constant 0 : index
    %c384_27 = arith.constant 384 : index
    %37 = vector.load %arg5[%c0_26, %c384_27] : memref<256x640xbf16, #tpu.memory_space<vmem>>, vector<256x256xbf16>
    %cst_28 = arith.constant dense<0.000000e+00> : vector<8x256xf32>
    %38 = tpu.matmul %34, %36, %cst_28 {dimension_numbers = #tpu.dot_dimension_numbers<[1], [0], [0], [1], [0, 0, 1, 1], [], []>} : vector<8x256xbf16>, vector<256x256xbf16>, vector<8x256xf32> -> vector<8x256xf32>
    %c0_29 = arith.constant 0 : index
    %c896 = arith.constant 896 : index
    %39 = vector.load %arg6[%c0_29, %c896] : memref<1x2048xf32, #tpu.memory_space<vmem>>, vector<1x256xf32>
    %40 = vector.broadcast %39 : vector<1x256xf32> to vector<8x256xf32>
    %41 = arith.addf %38, %40 : vector<8x256xf32>
    %cst_30 = arith.constant 0.000000e+00 : f32
    %42 = vector.broadcast %cst_30 : f32 to vector<8x256xf32>
    %43 = arith.maximumf %41, %42 : vector<8x256xf32>
    %cst_31 = arith.constant dense<0.000000e+00> : vector<8x256xf32>
    %44 = tpu.matmul %35, %37, %cst_31 {dimension_numbers = #tpu.dot_dimension_numbers<[1], [0], [0], [1], [0, 0, 1, 1], [], []>} : vector<8x256xbf16>, vector<256x256xbf16>, vector<8x256xf32> -> vector<8x256xf32>
    %c0_32 = arith.constant 0 : index
    %c1152 = arith.constant 1152 : index
    %45 = vector.load %arg6[%c0_32, %c1152] : memref<1x2048xf32, #tpu.memory_space<vmem>>, vector<1x256xf32>
    %46 = vector.broadcast %45 : vector<1x256xf32> to vector<8x256xf32>
    %47 = arith.addf %44, %46 : vector<8x256xf32>
    %cst_33 = arith.constant 0.000000e+00 : f32
    %48 = vector.broadcast %cst_33 : f32 to vector<8x256xf32>
    %49 = arith.maximumf %47, %48 : vector<8x256xf32>
    %c0_34 = arith.constant 0 : index
    %c640 = arith.constant 640 : index
    %50 = vector.load %arg8[%c0_34, %c640] : memref<8x1792xf32, #tpu.memory_space<vmem>>, vector<8x256xf32>
    tpu.vector_store %arg8[%c0_34, %c640], %43 {strides = array<i32>} : memref<8x1792xf32, #tpu.memory_space<vmem>>, vector<8x256xf32>,
    %c0_35 = arith.constant 0 : index
    %c896_36 = arith.constant 896 : index
    %51 = vector.load %arg8[%c0_35, %c896_36] : memref<8x1792xf32, #tpu.memory_space<vmem>>, vector<8x256xf32>
    tpu.vector_store %arg8[%c0_35, %c896_36], %49 {strides = array<i32>} : memref<8x1792xf32, #tpu.memory_space<vmem>>, vector<8x256xf32>,
    tpu.wait_dma2 semaphore(%arg10 : memref<!tpu.dma_semaphore, #tpu.memory_space<semaphore_mem>>) src(%arg7 : memref<256x768xbf16, #tpu.memory_space<any>>) dst(%arg9 : memref<256x768xbf16, #tpu.memory_space<vmem>>)
    %c0_37 = arith.constant 0 : index
    %c0_38 = arith.constant 0 : index
    %52 = vector.load %arg9[%c0_37, %c0_38] : memref<256x768xbf16, #tpu.memory_space<vmem>>, vector<256x256xbf16>
    %c0_39 = arith.constant 0 : index
    %c256_40 = arith.constant 256 : index
    %53 = vector.load %arg9[%c0_39, %c256_40] : memref<256x768xbf16, #tpu.memory_space<vmem>>, vector<256x256xbf16>
    %c0_41 = arith.constant 0 : index
    %c512 = arith.constant 512 : index
    %54 = vector.load %arg9[%c0_41, %c512] : memref<256x768xbf16, #tpu.memory_space<vmem>>, vector<256x128xbf16>
    %c0_42 = arith.constant 0 : index
    %c640_43 = arith.constant 640 : index
    %55 = vector.load %arg9[%c0_42, %c640_43] : memref<256x768xbf16, #tpu.memory_space<vmem>>, vector<256x128xbf16>
    %56 = arith.truncf %43 : vector<8x256xf32> to vector<8x256xbf16>
    %cst_44 = arith.constant dense<0.000000e+00> : vector<8x256xf32>
    %57 = tpu.matmul %56, %52, %cst_44 {dimension_numbers = #tpu.dot_dimension_numbers<[1], [0], [0], [1], [0, 0, 1, 1], [], []>} : vector<8x256xbf16>, vector<256x256xbf16>, vector<8x256xf32> -> vector<8x256xf32>
    %c0_45 = arith.constant 0 : index
    %c1408 = arith.constant 1408 : index
    %58 = vector.load %arg6[%c0_45, %c1408] : memref<1x2048xf32, #tpu.memory_space<vmem>>, vector<1x256xf32>
    %59 = vector.broadcast %58 : vector<1x256xf32> to vector<8x256xf32>
    %60 = arith.addf %57, %59 : vector<8x256xf32>
    %cst_46 = arith.constant 0.000000e+00 : f32
    %61 = vector.broadcast %cst_46 : f32 to vector<8x256xf32>
    %62 = arith.maximumf %60, %61 : vector<8x256xf32>
    %63 = arith.truncf %49 : vector<8x256xf32> to vector<8x256xbf16>
    %cst_47 = arith.constant dense<0.000000e+00> : vector<8x256xf32>
    %64 = tpu.matmul %63, %53, %cst_47 {dimension_numbers = #tpu.dot_dimension_numbers<[1], [0], [0], [1], [0, 0, 1, 1], [], []>} : vector<8x256xbf16>, vector<256x256xbf16>, vector<8x256xf32> -> vector<8x256xf32>
    %c0_48 = arith.constant 0 : index
    %c1664 = arith.constant 1664 : index
    %65 = vector.load %arg6[%c0_48, %c1664] : memref<1x2048xf32, #tpu.memory_space<vmem>>, vector<1x256xf32>
    %66 = vector.broadcast %65 : vector<1x256xf32> to vector<8x256xf32>
    %67 = arith.addf %64, %66 : vector<8x256xf32>
    %cst_49 = arith.constant 0.000000e+00 : f32
    %68 = vector.broadcast %cst_49 : f32 to vector<8x256xf32>
    %69 = arith.maximumf %67, %68 : vector<8x256xf32>
    %c0_50 = arith.constant 0 : index
    %c1152_51 = arith.constant 1152 : index
    %70 = vector.load %arg8[%c0_50, %c1152_51] : memref<8x1792xf32, #tpu.memory_space<vmem>>, vector<8x256xf32>
    tpu.vector_store %arg8[%c0_50, %c1152_51], %62 {strides = array<i32>} : memref<8x1792xf32, #tpu.memory_space<vmem>>, vector<8x256xf32>,
    %c0_52 = arith.constant 0 : index
    %c1408_53 = arith.constant 1408 : index
    %71 = vector.load %arg8[%c0_52, %c1408_53] : memref<8x1792xf32, #tpu.memory_space<vmem>>, vector<8x256xf32>
    tpu.vector_store %arg8[%c0_52, %c1408_53], %69 {strides = array<i32>} : memref<8x1792xf32, #tpu.memory_space<vmem>>, vector<8x256xf32>,
    %72 = arith.truncf %62 : vector<8x256xf32> to vector<8x256xbf16>
    %cst_54 = arith.constant dense<0.000000e+00> : vector<8x128xf32>
    %73 = tpu.matmul %72, %54, %cst_54 {dimension_numbers = #tpu.dot_dimension_numbers<[1], [0], [0], [1], [0, 0, 1, 1], [], []>} : vector<8x256xbf16>, vector<256x128xbf16>, vector<8x128xf32> -> vector<8x128xf32>
    %74 = arith.truncf %69 : vector<8x256xf32> to vector<8x256xbf16>
    %cst_55 = arith.constant dense<0.000000e+00> : vector<8x128xf32>
    %75 = tpu.matmul %74, %55, %cst_55 {dimension_numbers = #tpu.dot_dimension_numbers<[1], [0], [0], [1], [0, 0, 1, 1], [], []>} : vector<8x256xbf16>, vector<256x128xbf16>, vector<8x128xf32> -> vector<8x128xf32>
    %76 = arith.addf %73, %75 : vector<8x128xf32>
    %c0_56 = arith.constant 0 : index
    %c1920 = arith.constant 1920 : index
    %77 = vector.load %arg6[%c0_56, %c1920] : memref<1x2048xf32, #tpu.memory_space<vmem>>, vector<1x128xf32>
    %78 = vector.broadcast %77 : vector<1x128xf32> to vector<8x128xf32>
    %79 = arith.addf %76, %78 : vector<8x128xf32>
    %c0_57 = arith.constant 0 : index
    %c1664_58 = arith.constant 1664 : index
    %80 = vector.load %arg8[%c0_57, %c1664_58] : memref<8x1792xf32, #tpu.memory_space<vmem>>, vector<8x128xf32>
    tpu.vector_store %arg8[%c0_57, %c1664_58], %79 {strides = array<i32>} : memref<8x1792xf32, #tpu.memory_space<vmem>>, vector<8x128xf32>,
    return
  }
}

</mosaic_0001>

<bundles_post_ra>
// kernel: mlp_disentangle_pos_forward.1
= control target key start
LH: loop header
LB: loop body
LE: loop exit
PB: predicated region body
PF: predicated region fallthrough
CT: control target
= control target key end

     0   :  { %13 = vsyncpa [#allocation5], 0  ;;  %s3482_s0 = inlined_call_operand.hbm [shape: f32[8,16], index: 0, kind: input, shape index: {}]   ;;  %s3483_s1 = inlined_call_operand.vmem [shape: f32[8,4], index: 1, kind: input, shape index: {}]   ;;  %s3484_s2 = inlined_call_operand.hbm [shape: f32[4,256], index: 2, kind: input, shape index: {}]   ;;  %s3485_s3 = inlined_call_operand.hbm [shape: f32[16,512], index: 3, kind: input, shape index: {}]   ;;  %s3486_s4 = inlined_call_operand.hbm [shape: bf16[128,512], index: 4, kind: input, shape index: {}]   ;;  %s3487_s5 = inlined_call_operand.hbm [shape: bf16[256,640], index: 5, kind: input, shape index: {}]   ;;  %s3488_s6 = inlined_call_operand.vmem [shape: f32[1,2048], index: 6, kind: input, shape index: {}]   ;;  %s3489_s7 = inlined_call_operand.hbm [shape: bf16[256,768], index: 7, kind: input, shape index: {}]   ;;  %s3490_s8 = inlined_call_operand.vmem [shape: f32[8,1792], index: 8, kind: output, shape index: {}]  }
   0x1   :  { %14 = vsyncpa [#allocation7], 0  ;;  %s34_s29 = sshll.u32 %s3484_s2, 4  ;;  %s35_s29 = int_to_ptr.hbm [resolvable:$true] %s34_s29 }
   0x2   :  { %15 = vsyncpa [#allocation10], 0  ;;  %s3308_s30 = smov [#allocation6]   ;;  %s57_s12 = sshll.u32 %s3486_s4, 4  ;;  %s58_s12 = int_to_ptr.hbm [resolvable:$true] %s57_s12 }
   0x3   :  { %s36_s9 = sshll.u32 %s3308_s30, 4  ;;  %s3309_s13 = smov [#allocation9]   ;;  %s37_s9 = int_to_ptr.vmem [resolvable:$true] %s36_s9 }
   0x4   :  { %39 = dma.hbm_to_vmem [thread:$0]  %s35_s29, 128, %s37_s9, [#allocation7]  }
   0x5   :  { %s59_s14 = sshll.u32 %s3309_s13, 4  ;;  %s3310_s15 = smov 256   ;;  %s60_s14 = int_to_ptr.vmem [resolvable:$true] %s59_s14 }
   0x6   :  { %s3311_s16 = smov 16   ;;  %s21_s2 = sshll.u32 %s3482_s0, 4  ;;  %s22_s2 = int_to_ptr.hbm [resolvable:$true] %s21_s2 }
   0x7   :  { %65 = dma.hbm_to_vmem [thread:$0]  %s58_s12, 4096, %s60_s14, [#allocation10], %s3310_s15, %s3310_s15, %s3311_s16  }
   0x8   :  { %s3312_s19 = smov [#allocation4]   ;;  %s44_s4 = sshll.u32 %s3485_s3, 4  ;;  %s45_s4 = int_to_ptr.hbm [resolvable:$true] %s44_s4 }
   0x9   :  { %s23_s20 = sshll.u32 %s3312_s19, 4  ;;  %s3313_s23 = smov [#allocation8]   ;;  %s24_s20 = int_to_ptr.vmem [resolvable:$true] %s23_s20 }
   0xa   :  { %26 = dma.hbm_to_vmem [thread:$0]  %s22_s2, 128, %s24_s20, [#allocation5]  }
   0xb   :  { %s46_s24 = sshll.u32 %s3313_s23, 4  ;;  %s3314_s25 = smov 512   ;;  %s47_s24 = int_to_ptr.vmem [resolvable:$true] %s46_s24 }
   0xc   :  { %s3315_s26 = smov 32   ;;  %s70_s0 = sshll.u32 %s3487_s5, 4  ;;  %s71_s0 = int_to_ptr.hbm [resolvable:$true] %s70_s0 }
   0xd   :  { %52 = dma.hbm_to_vmem [thread:$0]  %s45_s4, 1024, %s47_s24, [#allocation7], %s3314_s25, %s3314_s25, %s3315_s26  }
   0xe   :  { %s3316_s29 = smov [#allocation11]   ;;  %s3317_s9 = smov 320  }
   0xf   :  { %s72_s30 = sshll.u32 %s3316_s29, 4  ;;  %s3318_s10 = smov 20   ;;  %s73_s30 = int_to_ptr.vmem [resolvable:$true] %s72_s30 }
  0x10   :  { %78 = dma.hbm_to_vmem [thread:$0]  %s71_s0, 10240, %s73_s30, [#allocation10], %s3317_s9, %s3317_s9, %s3318_s10  }
  0x11   :  { %3300 = dma.done.wait [#allocation5], 128  }
  0x12   :  { %3301 = vsyncadd [#allocation5], 4294967168 }
  0x13   :  { %3302 = dma.done.wait [#allocation7], 1152  }
  0x14   :  { %3303 = vsyncadd [#allocation7], 4294966144 }
  0x15   :  { %3304 = dma.done.wait [#allocation10], 14336  }
  0x16   :  { %3305 = vsyncadd [#allocation10], 4294952960  ;;  %v115_v0 = vld [vmem:[#allocation6] sm:$0xff]  ;;  %v2937_v2 = vld [vmem:[#allocation11 + $0x128] sm:$0xf0]  ;;  %vm130_vm0 = vcmask 1043456  }
  0x17   :  { %v2122_v1 = vld [vmem:[#allocation11 + $0x118] sm:$0xf]  ;;  %123 = vst [vmem:[#allocation1] ss:$2 sm:$0xff] %v115_v0  ;;  %v2945_v5 = vld [vmem:[#allocation11 + $0x268] sm:$0xf0] }
  0x18   :  { %v2154_v3 = vld [vmem:[#allocation11 + $0x258] sm:$0xf]  ;;  %v2123_v4 = vor.u32 %v2937_v2, %v2122_v1  ;;  %v2118_v6 = vld [vmem:[#allocation11 + $0xf0] sm:$0xf]  ;;  %v2936_v7 = vld [vmem:[#allocation11 + $0x100] sm:$0xf0] }
  0x19   :  { %v2155_v8 = vor.u32 %v2945_v5, %v2154_v3  ;;  %v2119_v9 = vor.u32 %v2936_v7, %v2118_v6  ;;  %v2150_v10 = vld [vmem:[#allocation11 + $0x230] sm:$0xf]  ;;  %v2944_v11 = vld [vmem:[#allocation11 + $0x240] sm:$0xf0]  ;;  %v2114_v12 = vld [vmem:[#allocation11 + $0xc8] sm:$0xf] }
  0x1a   :  { %311 = vmatpush.bf16.msra.mxu2 %v2123_v4  ;;  %v2935_v13 = vld [vmem:[#allocation11 + $0xd8] sm:$0xf0]  ;;  %v114_v14 = vld [vmem:[%s3483_s1] sm:$0xff]  ;;  %vm126_vm1 = vcmask 31744   ;;  %v2151_v15 = vor.u32 %v2944_v11, %v2150_v10  ;;  %v2110_v21 = vld [vmem:[#allocation11 + $0xa0] sm:$0xf] }
  0x1b   :  { %324 = vmatpush.bf16.msra.mxu3 %v2155_v8  ;;  %v2146_v16 = vld [vmem:[#allocation11 + $0x208] sm:$0xf]  ;;  %v2943_v17 = vld [vmem:[#allocation11 + $0x218] sm:$0xf0]  ;;  %v2115_v20 = vor.u32 %v2935_v13, %v2114_v12  ;;  %v2934_v22 = vld [vmem:[#allocation11 + $0xb0] sm:$0xf0] }
  0x1c   :  { %v2147_v23 = vor.u32 %v2943_v17, %v2146_v16  ;;  %v2111_v24 = vor.u32 %v2934_v22, %v2110_v21  ;;  %v2142_v25 = vld [vmem:[#allocation11 + $0x1e0] sm:$0xf]  ;;  %v2942_v26 = vld [vmem:[#allocation11 + $0x1f0] sm:$0xf0]  ;;  %v2106_v27 = vld [vmem:[#allocation11 + $0x78] sm:$0xf] }
  0x1d   :  { %v2933_v28 = vld [vmem:[#allocation11 + $0x88] sm:$0xf0]  ;;  %v2143_v29 = vor.u32 %v2942_v26, %v2142_v25  ;;  %v2138_v31 = vld [vmem:[#allocation11 + $0x1b8] sm:$0xf]  ;;  %v2102_v33 = vld [vmem:[#allocation11 + $0x50] sm:$0xf] }
  0x1e   :  { %v124_v18 = vld.sshfl [vmem:[#allocation1] sm:$0xff pattern:$0x75316420]  ;;  %v125_v19 = vld.sshfl [vmem:[#allocation1 + $0x8] sm:$0xff pattern:$0x75316420]  ;;  %312 = vmatpush.bf16.msra.mxu2 %v2119_v9  ;;  %v2107_v30 = vor.u32 %v2933_v28, %v2106_v27 }
  0x1f   :  { %2088 = vmatpush.msk.msra.mxu0 %vm130_vm0, %v124_v18  ;;  %2090 = vmatpush.msk.msra.mxu1 %vm130_vm0, %v125_v19  ;;  %v2941_v32 = vld [vmem:[#allocation11 + $0x1c8] sm:$0xf0]  ;;  %v2932_v34 = vld [vmem:[#allocation11 + $0x60] sm:$0xf0]  ;;  %v2134_v37 = vld [vmem:[#allocation11 + $0x190] sm:$0xf] }
  0x20   :  { %2089 = vmatmul.msk.f32.vlgmr.msra.gmra.mxu0 %vm126_vm1, %v114_v14  ;;  %2091 = vmatmul.msk.f32.vlgmr.msra.gmra.mxu1 %vm126_vm1, %v114_v14  ;;  %v2139_v35 = vor.u32 %v2941_v32, %v2138_v31  ;;  %v2103_v36 = vor.u32 %v2932_v34, %v2102_v33  ;;  %v2940_v38 = vld [vmem:[#allocation11 + $0x1a0] sm:$0xf0]  ;;  %v2098_v40 = vld [vmem:[#allocation11 + $0x28] sm:$0xf]  ;;  %v2931_v41 = vld [vmem:[#allocation11 + $0x38] sm:$0xf0] }
  0x21   :  { %325 = vmatpush.bf16.msra.mxu3 %v2151_v15  ;;  %v2135_v39 = vor.u32 %v2940_v38, %v2134_v37  ;;  %v2130_v42 = vld [vmem:[#allocation11 + $0x168] sm:$0xf]  ;;  %v2099_v43 = vor.u32 %v2931_v41, %v2098_v40  ;;  %v2939_v44 = vld [vmem:[#allocation11 + $0x178] sm:$0xf0]  ;;  %v2094_v46 = vld [vmem:[#allocation11] sm:$0xf] }
  0x22   :  { %313 = vmatpush.bf16.msra.mxu2 %v2115_v20  ;;  %v2131_v45 = vor.u32 %v2939_v44, %v2130_v42  ;;  %v2930_v47 = vld [vmem:[#allocation11 + $0x10] sm:$0xf0]  ;;  %v2126_v48 = vld [vmem:[#allocation11 + $0x140] sm:$0xf]  ;;  %v116_v52 = vld [vmem:[%s3488_s6] sm:$0x3] }
  0x23   :  { %v2095_v49 = vor.u32 %v2930_v47, %v2094_v46  ;;  %v2938_v50 = vld [vmem:[#allocation11 + $0x150] sm:$0xf0]  ;;  %v118_v53 = vperm.slane %v116_v52, 0  ;;  %v119_v54 = vperm.slane %v116_v52, 1  ;;  %v2271_v63 = vld [vmem:[#allocation9 + $0xe0] sm:$0xf] }
  0x24   :  { %v2127_v51 = vor.u32 %v2938_v50, %v2126_v48  ;;  %v2976_v0 = vld [vmem:[#allocation9 + $0xec] sm:$0xf0]  ;;  %v2974_v1 = vld [vmem:[#allocation9 + $0xe4] sm:$0xf]  ;;  %v2273_v3 = vld [vmem:[#allocation9 + $0xf0] sm:$0xf0] }
  0x25   :  { %326 = vmatpush.bf16.msra.mxu3 %v2147_v23  ;;  %v2272_v2 = vor.u32 %v2976_v0, %v2271_v63  ;;  %v2279_v4 = vld [vmem:[#allocation9 + $0xe8] sm:$0xf]  ;;  %v2977_v5 = vld [vmem:[#allocation9 + $0xf4] sm:$0xf0]  ;;  %v2276_v6 = vor.u32 %v2974_v1, %v2273_v3  ;;  %v2975_v8 = vld [vmem:[#allocation9 + $0xec] sm:$0xf] }
  0x26   :  { %314 = vmatpush.bf16.msra.mxu2 %v2111_v24  ;;  %v2280_v7 = vor.u32 %v2977_v5, %v2279_v4  ;;  %v2281_v9 = vld [vmem:[#allocation9 + $0xf8] sm:$0xf0]  ;;  %v2255_v11 = vld [vmem:[#allocation9 + $0xc0] sm:$0xf]  ;;  %v2972_v12 = vld [vmem:[#allocation9 + $0xcc] sm:$0xf0] }
  0x27   :  { %559 = vmatpush.bf16.msrb.mxu0 %v2272_v2  ;;  %v2284_v10 = vor.u32 %v2975_v8, %v2281_v9  ;;  %572 = vmatpush.bf16.msrb.mxu1 %v2276_v6  ;;  %v2970_v13 = vld [vmem:[#allocation9 + $0xc4] sm:$0xf]  ;;  %v2256_v14 = vor.u32 %v2972_v12, %v2255_v11  ;;  %v2257_v15 = vld [vmem:[#allocation9 + $0xd0] sm:$0xf0]  ;;  %v2263_v16 = vld [vmem:[#allocation9 + $0xc8] sm:$0xf] }
  0x28   :  { %v2973_v17 = vld [vmem:[#allocation9 + $0xd4] sm:$0xf0]  ;;  %v2260_v18 = vor.u32 %v2970_v13, %v2257_v15  ;;  %v2971_v20 = vld [vmem:[#allocation9 + $0xcc] sm:$0xf]  ;;  %v2265_v21 = vld [vmem:[#allocation9 + $0xd8] sm:$0xf0] }
  0x29   :  { %327 = vmatpush.bf16.msra.mxu3 %v2143_v29  ;;  %v2264_v19 = vor.u32 %v2973_v17, %v2263_v16  ;;  %v2268_v22 = vor.u32 %v2971_v20, %v2265_v21  ;;  %v2239_v23 = vld [vmem:[#allocation9 + $0xa0] sm:$0xf]  ;;  %v2968_v24 = vld [vmem:[#allocation9 + $0xac] sm:$0xf0]  ;;  %v2966_v25 = vld [vmem:[#allocation9 + $0xa4] sm:$0xf] }
  0x2a   :  { %315 = vmatpush.bf16.msra.mxu2 %v2107_v30  ;;  %v2240_v26 = vor.u32 %v2968_v24, %v2239_v23  ;;  %v2241_v27 = vld [vmem:[#allocation9 + $0xb0] sm:$0xf0]  ;;  %v2247_v28 = vld [vmem:[#allocation9 + $0xa8] sm:$0xf]  ;;  %v2969_v29 = vld [vmem:[#allocation9 + $0xb4] sm:$0xf0] }
  0x2b   :  { %560 = vmatpush.bf16.msrb.mxu0 %v2256_v14  ;;  %573 = vmatpush.bf16.msrb.mxu1 %v2260_v18  ;;  %v2244_v30 = vor.u32 %v2966_v25, %v2241_v27  ;;  %v2248_v31 = vor.u32 %v2969_v29, %v2247_v28  ;;  %v2967_v32 = vld [vmem:[#allocation9 + $0xac] sm:$0xf]  ;;  %v2249_v33 = vld [vmem:[#allocation9 + $0xb8] sm:$0xf0]  ;;  %v2962_v37 = vld [vmem:[#allocation9 + $0x84] sm:$0xf] }
  0x2c   :  { %v2252_v34 = vor.u32 %v2967_v32, %v2249_v33  ;;  %v2231_v40 = vld [vmem:[#allocation9 + $0x88] sm:$0xf]  ;;  %v2965_v41 = vld [vmem:[#allocation9 + $0x94] sm:$0xf0]  ;;  %v2963_v44 = vld [vmem:[#allocation9 + $0x8c] sm:$0xf] }
  0x2d   :  { %328 = vmatpush.bf16.msra.mxu3 %v2139_v35  ;;  %v2223_v35 = vld [vmem:[#allocation9 + $0x80] sm:$0xf]  ;;  %v2960_v48 = vld [vmem:[#allocation9 + $0x6c] sm:$0xf0]  ;;  %v2215_v52 = vld [vmem:[#allocation9 + $0x68] sm:$0xf] }
  0x2e   :  { %316 = vmatpush.bf16.msra.mxu2 %v2103_v36  ;;  %v2964_v36 = vld [vmem:[#allocation9 + $0x8c] sm:$0xf0]  ;;  %v2207_v47 = vld [vmem:[#allocation9 + $0x60] sm:$0xf]  ;;  %v2193_v63 = vld [vmem:[#allocation9 + $0x50] sm:$0xf0] }
  0x2f   :  { %561 = vmatpush.bf16.msrb.mxu0 %v2240_v26  ;;  %574 = vmatpush.bf16.msrb.mxu1 %v2244_v30  ;;  %v2224_v38 = vor.u32 %v2964_v36, %v2223_v35  ;;  %v2208_v50 = vor.u32 %v2960_v48, %v2207_v47  ;;  %v2199_v0 = vld [vmem:[#allocation9 + $0x48] sm:$0xf]  ;;  %v2957_v1 = vld [vmem:[#allocation9 + $0x54] sm:$0xf0]  ;;  %v2955_v4 = vld [vmem:[#allocation9 + $0x4c] sm:$0xf] }
  0x30   :  { %v2200_v3 = vor.u32 %v2957_v1, %v2199_v0  ;;  %v2201_v5 = vld [vmem:[#allocation9 + $0x58] sm:$0xf0]  ;;  %v2952_v8 = vld [vmem:[#allocation9 + $0x2c] sm:$0xf0]  ;;  %v2950_v9 = vld [vmem:[#allocation9 + $0x24] sm:$0xf] }
  0x31   :  { %329 = vmatpush.bf16.msra.mxu3 %v2135_v39  ;;  %v2225_v39 = vld [vmem:[#allocation9 + $0x90] sm:$0xf0]  ;;  %v2204_v6 = vor.u32 %v2955_v4, %v2201_v5  ;;  %v2183_v12 = vld [vmem:[#allocation9 + $0x28] sm:$0xf]  ;;  %v2953_v13 = vld [vmem:[#allocation9 + $0x34] sm:$0xf0] }
  0x32   :  { %317 = vmatpush.bf16.msra.mxu2 %v2099_v43  ;;  %v2228_v42 = vor.u32 %v2962_v37, %v2225_v39  ;;  %v2232_v43 = vor.u32 %v2965_v41, %v2231_v40  ;;  %v2177_v11 = vld [vmem:[#allocation9 + $0x30] sm:$0xf0]  ;;  %v3150_v14 = vld [vmem:[%s3488_s6 + $0x2] ss:$0 sm:$0xff]  ;;  %v2184_v16 = vor.u32 %v2953_v13, %v2183_v12  ;;  %v2951_v17 = vld [vmem:[#allocation9 + $0x2c] sm:$0xf] }
  0x33   :  { %562 = vmatpush.bf16.msrb.mxu0 %v2224_v38  ;;  %v2180_v15 = vor.u32 %v2950_v9, %v2177_v11  ;;  %v2185_v18 = vld [vmem:[#allocation9 + $0x38] sm:$0xf0]  ;;  %v2948_v21 = vld [vmem:[#allocation9 + $0xc] sm:$0xf0]  ;;  %v2161_v23 = vld [vmem:[#allocation9 + $0x10] sm:$0xf0] }
  0x34   :  { %575 = vmatpush.bf16.msrb.mxu1 %v2228_v42  ;;  %v2188_v20 = vor.u32 %v2951_v17, %v2185_v18  ;;  %v2167_v26 = vld [vmem:[#allocation9 + $0x8] sm:$0xf]  ;;  %v2949_v27 = vld [vmem:[#allocation9 + $0x14] sm:$0xf0]  ;;  %v2947_v28 = vld [vmem:[#allocation9 + $0xc] sm:$0xf] }
  0x35   :  { %330 = vmatpush.bf16.msra.mxu3 %v2131_v45  ;;  %v2233_v45 = vld [vmem:[#allocation9 + $0x98] sm:$0xf0]  ;;  %v2168_v29 = vor.u32 %v2949_v27, %v2167_v26  ;;  %v362_v36 = vld [vmem:[#allocation8 + $0x20] sm:$0xff]  ;;  %v363_v37 = vld [vmem:[#allocation8 + $0x28] sm:$0xff]  ;;  %vm611_vm6 = vcmask 130048   ;;  %s108_s26 = sshll.u32 %s3489_s7, 4  ;;  %s109_s26 = int_to_ptr.hbm [resolvable:$true] %s108_s26 }
  0x36   :  { %318 = vmatpush.bf16.msra.mxu2 %v2095_v49  ;;  %v2236_v46 = vor.u32 %v2963_v44, %v2233_v45  ;;  %v2958_v49 = vld [vmem:[#allocation9 + $0x64] sm:$0xf]  ;;  %v2169_v30 = vld [vmem:[#allocation9 + $0x18] sm:$0xf0]  ;;  %v359_v40 = vld [vmem:[#allocation8 + $0x8] sm:$0xff]  ;;  %s3319_s27 = smov [#allocation2]  }
  0x37   :  { %563 = vmatpush.bf16.msrb.mxu0 %v2208_v50  ;;  %v358_v38 = vld [vmem:[#allocation8] sm:$0xff]  ;;  %v2405_v0 = vld [vmem:[#allocation11 + $0x248] sm:$0xf0]  ;;  %v361_v11 = vld [vmem:[#allocation8 + $0x18] sm:$0xff]  ;;  %s110_s28 = sshll.u32 %s3319_s27, 4  ;;  %s111_s28 = int_to_ptr.vmem [resolvable:$true] %s110_s28 }
  0x38   :  { %v2397_v9 = vld [vmem:[#allocation11 + $0x220] sm:$0xf0]  ;;  %v2389_v17 = vld [vmem:[#allocation11 + $0x1f8] sm:$0xf0]  ;;  %v2339_v27 = vld [vmem:[#allocation11 + $0xf4] sm:$0xf] }
  0x39   :  { %331 = vmatpush.bf16.msra.mxu3 %v2127_v51  ;;  %v2209_v51 = vld [vmem:[#allocation9 + $0x70] sm:$0xf0]  ;;  %113 = dma.hbm_to_vmem [thread:$0]  %s109_s26, 12288, %s111_s28, [#allocation3] }
  0x3a   :  { %585 = vmatpush.bf16.msrb.mxu2 %v2280_v7  ;;  %v2175_v7 = vld [vmem:[#allocation9 + $0x20] sm:$0xf] }
  0x3d   :  { %598 = vmatpush.bf16.msrb.mxu3 %v2284_v10  ;;  %v2176_v10 = vor.u32 %v2952_v8, %v2175_v7  ;;  %v2333_v7 = vld [vmem:[#allocation11 + $0xe0] sm:$0xf0]  ;;  %v3004_v8 = vld [vmem:[#allocation11 + $0x210] sm:$0xf] }
  0x3e   :  { %586 = vmatpush.bf16.msrb.mxu2 %v2264_v19  ;;  %v2159_v19 = vld [vmem:[#allocation9] sm:$0xf]  ;;  %v2400_v13 = vor.u32 %v3004_v8, %v2397_v9 }
  0x3f   :  { %v2160_v24 = vor.u32 %v2948_v21, %v2159_v19  ;;  %v2993_v21 = vld [vmem:[#allocation11 + $0x12c] sm:$0xf0]  ;;  %v2997_v9 = vld [vmem:[#allocation11 + $0x17c] sm:$0xf0] }
  0x41   :  { %599 = vmatpush.bf16.msrb.mxu3 %v2268_v22  ;;  %v2946_v22 = vld [vmem:[#allocation9 + $0x4] sm:$0xf] }
  0x42   :  { %587 = vmatpush.bf16.msrb.mxu2 %v2248_v31  ;;  %v2164_v25 = vor.u32 %v2946_v22, %v2161_v23  ;;  %v2172_v31 = vor.u32 %v2947_v28, %v2169_v30  ;;  %v2411_v22 = vld [vmem:[#allocation11 + $0x25c] sm:$0xf]  ;;  %v3009_v23 = vld [vmem:[#allocation11 + $0x26c] sm:$0xf0]  ;;  %v2991_v28 = vld [vmem:[#allocation11 + $0x104] sm:$0xf0] }
  0x43   :  { %v2412_v26 = vor.u32 %v3009_v23, %v2411_v22  ;;  %v3007_v30 = vld [vmem:[#allocation11 + $0x244] sm:$0xf0] }
  0x44   :  { %v2978_v23 = vld [vmem:[#allocation11 + $0x8] sm:$0xf] }
  0x45   :  { %600 = vmatpush.bf16.msrb.mxu3 %v2252_v34 }
  0x46   :  { %588 = vmatpush.bf16.msrb.mxu2 %v2232_v43 }
  0x49   :  { %601 = vmatpush.bf16.msrb.mxu3 %v2236_v46 }
  0x9d   :  { %v152_v55 = vpop.f32.mrf.mxu0  ;;  %v172_v56 = vpop.f32.mrf.mxu1 }
  0x9e   :  { %v153_v57 = vadd.f32 %v152_v55, %v118_v53  ;;  %v173_v58 = vadd.f32 %v172_v56, %v119_v54  ;;  %v2961_v53 = vld [vmem:[#allocation9 + $0x74] sm:$0xf0]  ;;  %v2212_v54 = vor.u32 %v2958_v49, %v2209_v51  ;;  %v2959_v56 = vld [vmem:[#allocation9 + $0x6c] sm:$0xf]  ;;  %v2992_v51 = vld [vmem:[#allocation11 + $0x120] sm:$0xf] }
  0x9f   :  { %v2216_v55 = vor.u32 %v2961_v53, %v2215_v52  ;;  %v2349_v52 = vld [vmem:[#allocation11 + $0x130] sm:$0xf0] }
  0xa0   :  { %v175_v59 = vmax.f32 %v153_v57, 0.0  ;;  %v176_v60 = vmax.f32 %v173_v58, 0.0  ;;  %v2217_v57 = vld [vmem:[#allocation9 + $0x78] sm:$0xf0]  ;;  %576 = vmatpush.bf16.msrb.mxu1 %v2212_v54  ;;  %v2352_v54 = vor.u32 %v2992_v51, %v2349_v52  ;;  %v2317_v51 = vld [vmem:[#allocation11 + $0x90] sm:$0xf0] }
  0xa1   :  { %v2220_v58 = vor.u32 %v2959_v56, %v2217_v57  ;;  %589 = vmatpush.bf16.msrb.mxu2 %v2216_v55  ;;  %v3008_v55 = vld [vmem:[#allocation11 + $0x260] sm:$0xf]  ;;  %v2413_v56 = vld [vmem:[#allocation11 + $0x270] sm:$0xf0] }
  0xa2   :  { %v177_v61 = vpack.c.bf16 %v175_v59, %v175_v59  ;;  %v178_v62 = vpack.c.bf16 %v176_v60, %v176_v60  ;;  %v2191_v59 = vld [vmem:[#allocation9 + $0x40] sm:$0xf]  ;;  %v2956_v60 = vld [vmem:[#allocation9 + $0x4c] sm:$0xf0] }
  0xa3   :  { %602 = vmatpush.bf16.msrb.mxu3 %v2220_v58  ;;  %v2416_v58 = vor.u32 %v3008_v55, %v2413_v56  ;;  %v2381_v55 = vld [vmem:[#allocation11 + $0x1d0] sm:$0xf0] }
  0xa4   :  { %319 = vmatmul.bf16.vlgmr.msra.gmra.mxu2 %v177_v61  ;;  %332 = vmatmul.bf16.vlgmr.msra.gmra.mxu3 %v178_v62  ;;  %v2954_v61 = vld [vmem:[#allocation9 + $0x44] sm:$0xf]  ;;  %v2192_v62 = vor.u32 %v2956_v60, %v2191_v59  ;;  %v2990_v60 = vld [vmem:[#allocation11 + $0xf8] sm:$0xf]  ;;  %v2307_v56 = vld [vmem:[#allocation11 + $0x54] sm:$0xf] }
  0xa5   :  { %v2196_v2 = vor.u32 %v2954_v61, %v2193_v63  ;;  %590 = vmatpush.bf16.msrb.mxu2 %v2200_v3  ;;  %v2341_v61 = vld [vmem:[#allocation11 + $0x108] sm:$0xf0]  ;;  %v365_v3 = vld [vmem:[#allocation8 + $0x38] sm:$0xff] }
  0xa6   :  { %564 = vmatpush.bf16.msrb.mxu0 %v2192_v62  ;;  %v3006_v62 = vld [vmem:[#allocation11 + $0x238] sm:$0xf]  ;;  %v2344_v4 = vor.u32 %v2990_v60, %v2341_v61  ;;  %v2999_v60 = vld [vmem:[#allocation11 + $0x1a4] sm:$0xf0] }
  0xa7   :  { %577 = vmatpush.bf16.msrb.mxu1 %v2196_v2  ;;  %603 = vmatpush.bf16.msrb.mxu3 %v2204_v6  ;;  %v364_v2 = vld [vmem:[#allocation8 + $0x30] sm:$0xff]  ;;  %v2408_v5 = vor.u32 %v3006_v62, %v2405_v0  ;;  %v2309_v0 = vld [vmem:[#allocation11 + $0x68] sm:$0xf0] }
  0xa8   :  { %v2988_v6 = vld [vmem:[#allocation11 + $0xd0] sm:$0xf] }
  0xa9   :  { %591 = vmatpush.bf16.msrb.mxu2 %v2184_v16  ;;  %v2336_v12 = vor.u32 %v2988_v6, %v2333_v7  ;;  %v3002_v16 = vld [vmem:[#allocation11 + $0x1e8] sm:$0xf]  ;;  %v2981_v6 = vld [vmem:[#allocation11 + $0x3c] sm:$0xf0]  ;;  %v2363_v7 = vld [vmem:[#allocation11 + $0x16c] sm:$0xf] }
  0xaa   :  { %565 = vmatpush.bf16.msrb.mxu0 %v2176_v10  ;;  %v360_v10 = vld [vmem:[#allocation8 + $0x10] sm:$0xff]  ;;  %v2392_v19 = vor.u32 %v3002_v16, %v2389_v17  ;;  %v2291_v16 = vld [vmem:[#allocation11 + $0x4] sm:$0xf] }
  0xab   :  { %578 = vmatpush.bf16.msrb.mxu1 %v2180_v15  ;;  %604 = vmatpush.bf16.msrb.mxu3 %v2188_v20  ;;  %v2325_v15 = vld [vmem:[#allocation11 + $0xb8] sm:$0xf0] }
  0xac   :  { %v2347_v20 = vld [vmem:[#allocation11 + $0x11c] sm:$0xf] }
  0xad   :  { %592 = vmatpush.bf16.msrb.mxu2 %v2168_v29  ;;  %v2403_v29 = vld [vmem:[#allocation11 + $0x234] sm:$0xf] }
  0xae   :  { %566 = vmatpush.bf16.msrb.mxu0 %v2160_v24  ;;  %v357_v24 = vld [vmem:[#allocation4] sm:$0xff] }
  0xaf   :  { %579 = vmatpush.bf16.msrb.mxu1 %v2164_v25  ;;  %605 = vmatpush.bf16.msrb.mxu3 %v2172_v31  ;;  %v2348_v25 = vor.u32 %v2993_v21, %v2347_v20  ;;  %v2340_v31 = vor.u32 %v2991_v28, %v2339_v27  ;;  %v2995_v20 = vld [vmem:[#allocation11 + $0x154] sm:$0xf0]  ;;  %v2357_v27 = vld [vmem:[#allocation11 + $0x158] sm:$0xf0]  ;;  %v2475_v28 = vld [vmem:[#allocation11 + $0x124] sm:$0xf] }
  0xb1   :  { %982 = vmatpush.bf16.msra.mxu2 %v2352_v54  ;;  %v3000_v54 = vld [vmem:[#allocation11 + $0x1c0] sm:$0xf] }
  0xb2   :  { %629 = vmatpush.msra.mxu0 %v362_v36  ;;  %v3005_v36 = vld [vmem:[#allocation11 + $0x21c] sm:$0xf0] }
  0xb3   :  { %649 = vmatpush.msra.mxu1 %v363_v37  ;;  %995 = vmatpush.bf16.msra.mxu3 %v2416_v58  ;;  %v2983_v58 = vld [vmem:[#allocation11 + $0x64] sm:$0xf0] }
  0xb4   :  { %630 = vmatpush.msra.mxu0 %v358_v38  ;;  %v2308_v61 = vor.u32 %v2983_v58, %v2307_v56  ;;  %v3020_v58 = vld [vmem:[#allocation11 + $0xd8] sm:$0xf] }
  0xb5   :  { %650 = vmatpush.msra.mxu1 %v359_v40  ;;  %983 = vmatpush.bf16.msra.mxu2 %v2344_v4  ;;  %v2987_v40 = vld [vmem:[#allocation11 + $0xb4] sm:$0xf0] }
  0xb7   :  { %996 = vmatpush.bf16.msra.mxu3 %v2408_v5  ;;  %v2299_v5 = vld [vmem:[#allocation11 + $0x2c] sm:$0xf] }
  0xb8   :  { %v2300_v8 = vor.u32 %v2981_v6, %v2299_v5  ;;  %v3035_v5 = vld [vmem:[#allocation11 + $0x1fc] sm:$0xf0]  ;;  %v3018_v6 = vld [vmem:[#allocation11 + $0xb0] sm:$0xf] }
  0xb9   :  { %984 = vmatpush.bf16.msra.mxu2 %v2336_v12  ;;  %v2364_v12 = vor.u32 %v2997_v9, %v2363_v7  ;;  %v3034_v9 = vld [vmem:[#allocation11 + $0x1f0] sm:$0xf] }
  0xbb   :  { %997 = vmatpush.bf16.msra.mxu3 %v2400_v13 }
  0xbf   :  { %998 = vmatpush.bf16.msra.mxu3 %v2392_v19  ;;  %v2355_v19 = vld [vmem:[#allocation11 + $0x144] sm:$0xf] }
  0xc0   :  { %v2356_v22 = vor.u32 %v2995_v20, %v2355_v19  ;;  %v2445_v19 = vld [vmem:[#allocation11 + $0x98] sm:$0xf0] }
 0x127   :  { %v320_v32 = vpop.f32.mrf.mxu2  ;;  %v333_v33 = vpop.f32.mrf.mxu3 }
 0x128   :  { %v321_v34 = vadd.f32 %v3150_v14, %v320_v32  ;;  %v2986_v14 = vld [vmem:[#allocation11 + $0xa8] sm:$0xf]  ;;  %v2404_v32 = vor.u32 %v3007_v30, %v2403_v29  ;;  %v3025_v29 = vld [vmem:[#allocation11 + $0x134] sm:$0xf0] }
 0x129   :  { %v2328_v18 = vor.u32 %v2986_v14, %v2325_v15  ;;  %v2996_v14 = vld [vmem:[#allocation11 + $0x170] sm:$0xf]  ;;  %v2365_v15 = vld [vmem:[#allocation11 + $0x180] sm:$0xf0] }
 0x12a   :  { %v334_v35 = vadd.f32 %v333_v33, %v321_v34  ;;  %v2331_v33 = vld [vmem:[#allocation11 + $0xcc] sm:$0xf]  ;;  %v2989_v34 = vld [vmem:[#allocation11 + $0xdc] sm:$0xf0]  ;;  %v2368_v17 = vor.u32 %v2996_v14, %v2365_v15  ;;  %v3017_v14 = vld [vmem:[#allocation11 + $0x94] sm:$0xf0] }
 0x12b   :  { %985 = vmatpush.bf16.msra.mxu2 %v2328_v18  ;;  %v2332_v37 = vor.u32 %v2989_v34, %v2331_v33  ;;  %v2979_v18 = vld [vmem:[#allocation11 + $0x14] sm:$0xf0]  ;;  %v3024_v34 = vld [vmem:[#allocation11 + $0x128] sm:$0xf]  ;;  %v2507_v15 = vld [vmem:[#allocation11 + $0x1c4] sm:$0xf] }
 0x12c   :  { %v2156_v39 = vmul.f32 -1.442695, %v334_v35  ;;  %v2395_v35 = vld [vmem:[#allocation11 + $0x20c] sm:$0xf]  ;;  %v2292_v21 = vor.u32 %v2979_v18, %v2291_v16  ;;  %v3041_v33 = vld [vmem:[#allocation11 + $0x274] sm:$0xf0] }
 0x12d   :  { %v2396_v38 = vor.u32 %v3005_v36, %v2395_v35  ;;  %v2477_v36 = vld [vmem:[#allocation11 + $0x138] sm:$0xf0]  ;;  %v3016_v18 = vld [vmem:[#allocation11 + $0x88] sm:$0xf] }
 0x12e   :  { %3151 = vpow2.f32 %v2156_v39  ;;  %v2323_v39 = vld [vmem:[#allocation11 + $0xa4] sm:$0xf] }
 0x12f   :  { %v322_v41 = vpop.f32.mrf.mxu2  ;;  %v335_v42 = vpop.f32.mrf.mxu3 }
 0x130   :  { %v2387_v41 = vld [vmem:[#allocation11 + $0x1e4] sm:$0xf]  ;;  %v3003_v42 = vld [vmem:[#allocation11 + $0x1f4] sm:$0xf0] }
 0x134   :  { %v3152_v43 = vpop.eup %3151 }
 0x135   :  { %v340_v44 = vadd.f32 1.0, %v3152_v43  ;;  %v2324_v43 = vor.u32 %v2987_v40, %v2323_v39  ;;  %v2480_v39 = vor.u32 %v3024_v34, %v2477_v36  ;;  %v3030_v36 = vld [vmem:[#allocation11 + $0x1a0] sm:$0xf] }
 0x137   :  { %3153 = vrcp.f32 %v340_v44  ;;  %v350_v48 = vand.u32 2147483647, %v340_v44  ;;  %v352_v49 = vand.u32 2147483648, %v340_v44  ;;  %vm346_vm3 = vweird.f32 %v340_v44 }
 0x139   :  { %vm351_vm5 = vcmp.eq.f32.partialorder %v350_v48, 8.507059e+37  ;;  %v353_v57 = vor.u32 1.1754944e-38, %v352_v49  ;;  %v3001_v49 = vld [vmem:[#allocation11 + $0x1cc] sm:$0xf0] }
 0x13d   :  { %v3154_v45 = vpop.eup %3153 }
 0x13e   :  { %v342_v46 = vmul.f32 %v3154_v45, %v340_v44  ;;  %vm347_vm2 = vweird.f32 %v3154_v45  ;;  %v2388_v44 = vor.u32 %v3003_v42, %v2387_v41  ;;  %v2467_v41 = vld [vmem:[#allocation11 + $0xfc] sm:$0xf]  ;;  %v3023_v42 = vld [vmem:[#allocation11 + $0x10c] sm:$0xf0] }
 0x13f   :  { %vm348_vm4 = vmor %vm346_vm3, %vm347_vm2 }
 0x140   :  { %v343_v47 = vsub.f32 1.0, %v342_v46  ;;  %v2985_v46 = vld [vmem:[#allocation11 + $0x8c] sm:$0xf0] }
 0x142   :  { %v344_v50 = vmul.f32 %v3154_v45, %v343_v47  ;;  %v2379_v47 = vld [vmem:[#allocation11 + $0x1bc] sm:$0xf] }
 0x143   :  { %v2380_v52 = vor.u32 %v3001_v49, %v2379_v47  ;;  %v3038_v49 = vld [vmem:[#allocation11 + $0x240] sm:$0xf] }
 0x144   :  { %v345_v53 = vadd.f32 %v3154_v45, %v344_v50  ;;  %v2984_v50 = vld [vmem:[#allocation11 + $0x80] sm:$0xf] }
 0x146   :  { %v349_v59 = vsel %vm348_vm4, %v3154_v45, %v345_v53  ;;  %v2315_v45 = vld [vmem:[#allocation11 + $0x7c] sm:$0xf]  ;;  %v2320_v53 = vor.u32 %v2984_v50, %v2317_v51  ;;  %v2533_v51 = vld [vmem:[#allocation11 + $0x250] sm:$0xf0] }
 0x147   :  { %v354_v63 = vsel %vm351_vm5, %v353_v57, %v349_v59  ;;  %v2316_v48 = vor.u32 %v2985_v46, %v2315_v45  ;;  %v2384_v57 = vor.u32 %v3000_v54, %v2381_v55  ;;  %v2371_v59 = vld [vmem:[#allocation11 + $0x194] sm:$0xf]  ;;  %v3039_v45 = vld [vmem:[#allocation11 + $0x24c] sm:$0xf0]  ;;  %v3022_v46 = vld [vmem:[#allocation11 + $0x100] sm:$0xf] }
 0x148   :  { %356 = vst [vmem:[%s3490_s8] sm:$0xff] %v354_v63  ;;  %v366_v1 = vpack.c.bf16 %v354_v63, %v354_v63  ;;  %986 = vmatpush.bf16.msra.mxu2 %v2320_v53  ;;  %v2372_v62 = vor.u32 %v2999_v60, %v2371_v59  ;;  %v2982_v63 = vld [vmem:[#allocation11 + $0x58] sm:$0xf]  ;;  %v2459_v53 = vld [vmem:[#allocation11 + $0xd4] sm:$0xf]  ;;  %v3021_v54 = vld [vmem:[#allocation11 + $0xe4] sm:$0xf0] }
 0x149   :  { %999 = vmatpush.bf16.msra.mxu3 %v2384_v57  ;;  %v2523_v55 = vld [vmem:[#allocation11 + $0x214] sm:$0xf]  ;;  %v2460_v56 = vor.u32 %v3021_v54, %v2459_v53  ;;  %v3037_v57 = vld [vmem:[#allocation11 + $0x224] sm:$0xf0]  ;;  %v2461_v59 = vld [vmem:[#allocation11 + $0xe8] sm:$0xf0] }
 0x14a   :  { %567 = vmatmul.bf16.vlgmr.msrb.gmra.mxu0 %v366_v1  ;;  %580 = vmatmul.bf16.vlgmr.msrb.gmra.mxu1 %v366_v1  ;;  %v2524_v60 = vor.u32 %v3037_v57, %v2523_v55  ;;  %v2483_v53 = vld [vmem:[#allocation11 + $0x14c] sm:$0xf]  ;;  %v3027_v54 = vld [vmem:[#allocation11 + $0x15c] sm:$0xf0]  ;;  %v3010_v55 = vld [vmem:[#allocation11 + $0x10] sm:$0xf] }
 0x14b   :  { %593 = vmatmul.bf16.vlgmr.msrb.gmra.mxu2 %v366_v1  ;;  %606 = vmatmul.bf16.vlgmr.msrb.gmra.mxu3 %v366_v1  ;;  %v2998_v1 = vld [vmem:[#allocation11 + $0x198] sm:$0xf] }
 0x14c   :  { %669 = vmatpush.msrb.mxu0 %v364_v2  ;;  %689 = vmatpush.msrb.mxu1 %v365_v3  ;;  %v2312_v2 = vor.u32 %v2982_v63, %v2309_v0  ;;  %v2373_v3 = vld [vmem:[#allocation11 + $0x1a8] sm:$0xf0] }
 0x14d   :  { %v2376_v4 = vor.u32 %v2998_v1, %v2373_v3  ;;  %v2525_v63 = vld [vmem:[#allocation11 + $0x228] sm:$0xf0] }
 0x14e   :  { %670 = vmatpush.msrb.mxu0 %v360_v10  ;;  %690 = vmatpush.msrb.mxu1 %v361_v11  ;;  %v2980_v10 = vld [vmem:[#allocation11 + $0x30] sm:$0xf]  ;;  %v2301_v11 = vld [vmem:[#allocation11 + $0x40] sm:$0xf0]  ;;  %v2451_v1 = vld [vmem:[#allocation11 + $0xac] sm:$0xf] }
 0x14f   :  { %987 = vmatpush.bf16.msra.mxu2 %v2312_v2  ;;  %1000 = vmatpush.bf16.msra.mxu3 %v2376_v4  ;;  %v2304_v13 = vor.u32 %v2980_v10, %v2301_v11  ;;  %v3019_v2 = vld [vmem:[#allocation11 + $0xbc] sm:$0xf0]  ;;  %v2515_v3 = vld [vmem:[#allocation11 + $0x1ec] sm:$0xf]  ;;  %v2517_v11 = vld [vmem:[#allocation11 + $0x200] sm:$0xf0] }
 0x150   :  { %v2452_v4 = vor.u32 %v3019_v2, %v2451_v1  ;;  %v2516_v7 = vor.u32 %v3035_v5, %v2515_v3  ;;  %v695_v3 = vld [vmem:[%s3488_s6 + $0x3] sm:$0xf] }
 0x153   :  { %988 = vmatpush.bf16.msra.mxu2 %v2304_v13  ;;  %1001 = vmatpush.bf16.msra.mxu3 %v2368_v17  ;;  %v2443_v13 = vld [vmem:[#allocation11 + $0x84] sm:$0xf]  ;;  %v3033_v17 = vld [vmem:[#allocation11 + $0x1d4] sm:$0xf0] }
 0x154   :  { %v2444_v16 = vor.u32 %v3017_v14, %v2443_v13  ;;  %v2508_v20 = vor.u32 %v3033_v17, %v2507_v15  ;;  %v699_v17 = vperm.slane %v695_v3, 2 }
 0x15a   :  { %2285 = vmatmul.msk.f32.vlgmr.msra.gmra.mxu0 %vm611_vm6, %v357_v24  ;;  %2286 = vmatmul.msk.f32.vlgmr.msra.gmra.mxu1 %vm611_vm6, %v357_v24 }
 0x15b   :  { %956 = vmatpush.bf16.msra.mxu0 %v2348_v25  ;;  %969 = vmatpush.bf16.msra.mxu1 %v2412_v26  ;;  %v2994_v25 = vld [vmem:[#allocation11 + $0x148] sm:$0xf] }
 0x15c   :  { %v2360_v30 = vor.u32 %v2994_v25, %v2357_v27  ;;  %v2435_v27 = vld [vmem:[#allocation11 + $0x5c] sm:$0xf] }
 0x15e   :  { %1002 = vmatpush.bf16.msra.mxu3 %v2360_v30 }
 0x15f   :  { %957 = vmatpush.bf16.msra.mxu0 %v2340_v31  ;;  %970 = vmatpush.bf16.msra.mxu1 %v2404_v32  ;;  %v2476_v31 = vor.u32 %v3025_v29, %v2475_v28  ;;  %v2539_v32 = vld [vmem:[#allocation11 + $0x264] sm:$0xf]  ;;  %v3015_v28 = vld [vmem:[#allocation11 + $0x6c] sm:$0xf0]  ;;  %v2499_v29 = vld [vmem:[#allocation11 + $0x19c] sm:$0xf] }
 0x160   :  { %v2540_v35 = vor.u32 %v3041_v33, %v2539_v32  ;;  %v2436_v30 = vor.u32 %v3015_v28, %v2435_v27  ;;  %v3014_v32 = vld [vmem:[#allocation11 + $0x60] sm:$0xf]  ;;  %v2437_v33 = vld [vmem:[#allocation11 + $0x70] sm:$0xf0] }
 0x162   :  { %2287 = vmatmul.msk.f32.vlgmr.msrb.gmra.mxu0 %vm611_vm6, %v357_v24  ;;  %2288 = vmatmul.msk.f32.vlgmr.msrb.gmra.mxu1 %vm611_vm6, %v357_v24  ;;  %v2293_v24 = vld [vmem:[#allocation11 + $0x18] sm:$0xf0] }
 0x163   :  { %958 = vmatpush.bf16.msra.mxu0 %v2332_v37  ;;  %971 = vmatpush.bf16.msra.mxu1 %v2396_v38  ;;  %v2296_v26 = vor.u32 %v2978_v23, %v2293_v24  ;;  %v3040_v37 = vld [vmem:[#allocation11 + $0x268] sm:$0xf]  ;;  %v2541_v38 = vld [vmem:[#allocation11 + $0x278] sm:$0xf0] }
 0x164   :  { %v2544_v40 = vor.u32 %v3040_v37, %v2541_v38  ;;  %v2509_v23 = vld [vmem:[#allocation11 + $0x1d8] sm:$0xf0]  ;;  %v2501_v37 = vld [vmem:[#allocation11 + $0x1b0] sm:$0xf0] }
 0x165   :  { %989 = vmatpush.bf16.msra.mxu2 %v2296_v26  ;;  %v2427_v38 = vld [vmem:[#allocation11 + $0x34] sm:$0xf] }
 0x166   :  { %1222 = vmatpush.bf16.msrb.mxu3 %v2544_v40  ;;  %v3013_v40 = vld [vmem:[#allocation11 + $0x44] sm:$0xf0] }
 0x167   :  { %959 = vmatpush.bf16.msra.mxu0 %v2324_v43  ;;  %972 = vmatpush.bf16.msra.mxu1 %v2388_v44  ;;  %v2531_v43 = vld [vmem:[#allocation11 + $0x23c] sm:$0xf]  ;;  %v2468_v44 = vor.u32 %v3023_v42, %v2467_v41  ;;  %v2491_v41 = vld [vmem:[#allocation11 + $0x174] sm:$0xf]  ;;  %v3029_v42 = vld [vmem:[#allocation11 + $0x184] sm:$0xf0] }
 0x168   :  { %v2532_v47 = vor.u32 %v3039_v45, %v2531_v43  ;;  %v2428_v43 = vor.u32 %v3013_v40, %v2427_v38  ;;  %v2429_v45 = vld [vmem:[#allocation11 + $0x48] sm:$0xf0] }
 0x169   :  { %1209 = vmatpush.bf16.msrb.mxu2 %v2480_v39  ;;  %v2504_v39 = vor.u32 %v3030_v36, %v2501_v37  ;;  %v783_v36 = vld [vmem:[%s3488_s6 + $0x7] sm:$0x3] }
 0x16a   :  { %v785_v37 = vperm.slane %v783_v36, 0 }
 0x16b   :  { %960 = vmatpush.bf16.msra.mxu0 %v2316_v48  ;;  %973 = vmatpush.bf16.msra.mxu1 %v2380_v52  ;;  %v2469_v48 = vld [vmem:[#allocation11 + $0x110] sm:$0xf0]  ;;  %v2536_v52 = vor.u32 %v3038_v49, %v2533_v51  ;;  %v2493_v49 = vld [vmem:[#allocation11 + $0x188] sm:$0xf0]  ;;  %v3011_v51 = vld [vmem:[#allocation11 + $0x1c] sm:$0xf0] }
 0x16c   :  { %v2472_v50 = vor.u32 %v3022_v46, %v2469_v48  ;;  %v3028_v46 = vld [vmem:[#allocation11 + $0x178] sm:$0xf] }
 0x16d   :  { %1223 = vmatpush.bf16.msrb.mxu3 %v2536_v52  ;;  %v2496_v52 = vor.u32 %v3028_v46, %v2493_v49 }
 0x16e   :  { %1210 = vmatpush.bf16.msrb.mxu2 %v2472_v50  ;;  %v2419_v50 = vld [vmem:[#allocation11 + $0xc] sm:$0xf] }
 0x16f   :  { %961 = vmatpush.bf16.msra.mxu0 %v2308_v61  ;;  %974 = vmatpush.bf16.msra.mxu1 %v2372_v62  ;;  %v2464_v61 = vor.u32 %v3020_v58, %v2461_v59  ;;  %v3036_v62 = vld [vmem:[#allocation11 + $0x218] sm:$0xf]  ;;  %v2421_v58 = vld [vmem:[#allocation11 + $0x20] sm:$0xf0]  ;;  %v3026_v59 = vld [vmem:[#allocation11 + $0x150] sm:$0xf] }
 0x170   :  { %v2528_v0 = vor.u32 %v3036_v62, %v2525_v63  ;;  %v2420_v63 = vor.u32 %v3011_v51, %v2419_v50  ;;  %v2424_v1 = vor.u32 %v3010_v55, %v2421_v58  ;;  %v1010_v50 = vld [vmem:[%s3488_s6 + $0x9] sm:$0x3] }
 0x172   :  { %1211 = vmatpush.bf16.msrb.mxu2 %v2464_v61  ;;  %1224 = vmatpush.bf16.msrb.mxu3 %v2528_v0  ;;  %v2484_v0 = vor.u32 %v3027_v54, %v2483_v53 }
 0x173   :  { %962 = vmatpush.bf16.msra.mxu0 %v2300_v8  ;;  %975 = vmatpush.bf16.msra.mxu1 %v2364_v12  ;;  %v2453_v8 = vld [vmem:[#allocation11 + $0xc0] sm:$0xf0]  ;;  %v2520_v12 = vor.u32 %v3034_v9, %v2517_v11 }
 0x174   :  { %v2456_v10 = vor.u32 %v3018_v6, %v2453_v8  ;;  %v697_v6 = vperm.slane %v695_v3, 0 }
 0x176   :  { %1212 = vmatpush.bf16.msrb.mxu2 %v2456_v10  ;;  %1225 = vmatpush.bf16.msrb.mxu3 %v2520_v12 }
 0x177   :  { %963 = vmatpush.bf16.msra.mxu0 %v2292_v21  ;;  %976 = vmatpush.bf16.msra.mxu1 %v2356_v22  ;;  %v2448_v21 = vor.u32 %v3016_v18, %v2445_v19  ;;  %v3032_v22 = vld [vmem:[#allocation11 + $0x1c8] sm:$0xf]  ;;  %v700_v18 = vperm.slane %v695_v3, 3 }
 0x178   :  { %v2512_v24 = vor.u32 %v3032_v22, %v2509_v23 }
 0x17a   :  { %1213 = vmatpush.bf16.msrb.mxu2 %v2448_v21  ;;  %1226 = vmatpush.bf16.msrb.mxu3 %v2512_v24 }
 0x17b   :  { %1183 = vmatpush.bf16.msrb.mxu0 %v2476_v31  ;;  %1196 = vmatpush.bf16.msrb.mxu1 %v2540_v35  ;;  %v3031_v31 = vld [vmem:[#allocation11 + $0x1ac] sm:$0xf0]  ;;  %v2440_v35 = vor.u32 %v3014_v32, %v2437_v33 }
 0x17c   :  { %v2500_v34 = vor.u32 %v3031_v31, %v2499_v29 }
 0x17e   :  { %1214 = vmatpush.bf16.msrb.mxu2 %v2440_v35  ;;  %1227 = vmatpush.bf16.msrb.mxu3 %v2504_v39 }
 0x17f   :  { %1184 = vmatpush.bf16.msrb.mxu0 %v2468_v44  ;;  %1197 = vmatpush.bf16.msrb.mxu1 %v2532_v47  ;;  %v3012_v44 = vld [vmem:[#allocation11 + $0x38] sm:$0xf]  ;;  %v2492_v47 = vor.u32 %v3029_v42, %v2491_v41  ;;  %v786_v42 = vperm.slane %v783_v36, 1 }
 0x180   :  { %v2432_v48 = vor.u32 %v3012_v44, %v2429_v45 }
 0x182   :  { %1215 = vmatpush.bf16.msrb.mxu2 %v2432_v48  ;;  %1228 = vmatpush.bf16.msrb.mxu3 %v2496_v52  ;;  %v1012_v52 = vperm.slane %v1010_v50, 0 }
 0x183   :  { %1185 = vmatpush.bf16.msrb.mxu0 %v2460_v56  ;;  %1198 = vmatpush.bf16.msrb.mxu1 %v2524_v60  ;;  %v2485_v60 = vld [vmem:[#allocation11 + $0x160] sm:$0xf0] }
 0x184   :  { %v2488_v2 = vor.u32 %v3026_v59, %v2485_v60  ;;  %v1013_v59 = vperm.slane %v1010_v50, 1 }
 0x186   :  { %1216 = vmatpush.bf16.msrb.mxu2 %v2424_v1  ;;  %1229 = vmatpush.bf16.msrb.mxu3 %v2488_v2 }
 0x187   :  { %1186 = vmatpush.bf16.msrb.mxu0 %v2452_v4  ;;  %1199 = vmatpush.bf16.msrb.mxu1 %v2516_v7  ;;  %v698_v7 = vperm.slane %v695_v3, 1 }
 0x18b   :  { %1187 = vmatpush.bf16.msrb.mxu0 %v2444_v16  ;;  %1200 = vmatpush.bf16.msrb.mxu1 %v2508_v20 }
 0x18f   :  { %1188 = vmatpush.bf16.msrb.mxu0 %v2436_v30  ;;  %1201 = vmatpush.bf16.msrb.mxu1 %v2500_v34 }
 0x193   :  { %1189 = vmatpush.bf16.msrb.mxu0 %v2428_v43  ;;  %1202 = vmatpush.bf16.msrb.mxu1 %v2492_v47 }
 0x197   :  { %1190 = vmatpush.bf16.msrb.mxu0 %v2420_v63  ;;  %1203 = vmatpush.bf16.msrb.mxu1 %v2484_v0 }
 0x1c7   :  { %v3396_v25 = vpop.f32.mrf.mxu0  ;;  %v3398_v26 = vpop.f32.mrf.mxu1 }
 0x1ce   :  { %v594_v56 = vpop.f32.mrf.mxu2  ;;  %v607_v57 = vpop.f32.mrf.mxu3 }
 0x1cf   :  { %v570_v61 = vpop.f32.mrf.mxu0  ;;  %v583_v62 = vpop.f32.mrf.mxu1 }
 0x1d6   :  { %v596_v4 = vpop.f32.mrf.mxu2  ;;  %v609_v5 = vpop.f32.mrf.mxu3 }
 0x1d7   :  { %v632_v8 = vpop.f32.mrf.mxu0  ;;  %v652_v9 = vpop.f32.mrf.mxu1 }
 0x1d8   :  { %v633_v10 = vadd.f32 %v632_v8, %v3396_v25  ;;  %v653_v11 = vadd.f32 %v652_v9, %v3398_v26 }
 0x1da   :  { %v705_v12 = vadd.f32 %v697_v6, %v633_v10  ;;  %v706_v13 = vadd.f32 %v698_v7, %v653_v11 }
 0x1dc   :  { %v709_v14 = vmax.f32 %v705_v12, 0.0  ;;  %v710_v15 = vmax.f32 %v706_v13, 0.0 }
 0x1de   :  { %713 = vst [vmem:[%s3490_s8 + $0x8] sm:$0xff] %v709_v14  ;;  %v717_v16 = vpack.c.bf16 %v710_v15, %v709_v14 }
 0x1df   :  { %714 = vst [vmem:[%s3490_s8 + $0x10] sm:$0xff] %v710_v15  ;;  %v672_v19 = vpop.f32.mrf.mxu0  ;;  %v692_v20 = vpop.f32.mrf.mxu1 }
 0x1e0   :  { %v790_v21 = vunpack.c.l.b16 %v717_v16  ;;  %v791_v22 = vunpack.c.h.b16 %v717_v16  ;;  %v673_v23 = vadd.f32 %v672_v19, %v594_v56  ;;  %v693_v24 = vadd.f32 %v692_v20, %v607_v57 }
 0x1e2   :  { %v707_v25 = vadd.f32 %v699_v17, %v673_v23  ;;  %v708_v26 = vadd.f32 %v700_v18, %v693_v24  ;;  %v792_v27 = vpack.c.b16 %v790_v21, %v790_v21  ;;  %v793_v28 = vpack.c.b16 %v791_v22, %v791_v22 }
 0x1e4   :  { %v711_v29 = vmax.f32 %v707_v25, 0.0  ;;  %v712_v30 = vmax.f32 %v708_v26, 0.0  ;;  %964 = vmatmul.bf16.vlgmr.msra.gmra.mxu0 %v792_v27  ;;  %977 = vmatmul.bf16.vlgmr.msra.gmra.mxu1 %v793_v28 }
 0x1e5   :  { %990 = vmatmul.bf16.vlgmr.msra.gmra.mxu2 %v792_v27  ;;  %1003 = vmatmul.bf16.vlgmr.msra.gmra.mxu3 %v793_v28 }
 0x1e6   :  { %715 = vst [vmem:[%s3490_s8 + $0x18] sm:$0xff] %v711_v29  ;;  %v718_v31 = vpack.c.bf16 %v712_v30, %v711_v29 }
 0x1e7   :  { %716 = vst [vmem:[%s3490_s8 + $0x20] sm:$0xff] %v712_v30 }
 0x1e8   :  { %v1017_v32 = vunpack.c.l.b16 %v718_v31  ;;  %v1018_v33 = vunpack.c.h.b16 %v718_v31 }
 0x1ea   :  { %v1019_v34 = vpack.c.b16 %v1017_v32, %v1017_v32  ;;  %v1020_v35 = vpack.c.b16 %v1018_v33, %v1018_v33 }
 0x1f4   :  { %1191 = vmatmul.bf16.vlgmr.msrb.gmra.mxu0 %v1019_v34  ;;  %1204 = vmatmul.bf16.vlgmr.msrb.gmra.mxu1 %v1020_v35 }
 0x1f5   :  { %1217 = vmatmul.bf16.vlgmr.msrb.gmra.mxu2 %v1019_v34  ;;  %1230 = vmatmul.bf16.vlgmr.msrb.gmra.mxu3 %v1020_v35 }
 0x261   :  { %v965_v38 = vpop.f32.mrf.mxu0  ;;  %v978_v39 = vpop.f32.mrf.mxu1 }
 0x262   :  { %v966_v40 = vadd.f32 %v965_v38, %v785_v37 }
 0x264   :  { %v979_v41 = vadd.f32 %v978_v39, %v966_v40 }
 0x266   :  { %v3423_v43 = vmax.f32 %v979_v41, 0.0 }
 0x268   :  { %1237 = vst [vmem:[%s3490_s8 + $0x28] sm:$0xff] %v3423_v43  ;;  %v991_v44 = vpop.f32.mrf.mxu2  ;;  %v1004_v45 = vpop.f32.mrf.mxu3 }
 0x269   :  { %v992_v46 = vadd.f32 %v991_v44, %v786_v42  ;;  %v967_v47 = vpop.f32.mrf.mxu0  ;;  %v980_v48 = vpop.f32.mrf.mxu1 }
 0x26b   :  { %v1005_v49 = vadd.f32 %v1004_v45, %v992_v46 }
 0x26d   :  { %v3432_v51 = vmax.f32 %v1005_v49, 0.0 }
 0x26f   :  { %1238 = vst [vmem:[%s3490_s8 + $0x30] sm:$0xff] %v3432_v51 }
 0x270   :  { %v993_v53 = vpop.f32.mrf.mxu2  ;;  %v1006_v54 = vpop.f32.mrf.mxu3 }
 0x271   :  { %v1192_v55 = vpop.f32.mrf.mxu0  ;;  %v1205_v56 = vpop.f32.mrf.mxu1 }
 0x272   :  { %v1193_v57 = vadd.f32 %v1192_v55, %v1012_v52 }
 0x274   :  { %v1206_v58 = vadd.f32 %v1205_v56, %v1193_v57 }
 0x276   :  { %v3438_v60 = vmax.f32 %v1206_v58, 0.0 }
 0x278   :  { %1239 = vst [vmem:[%s3490_s8 + $0x38] sm:$0xff] %v3438_v60  ;;  %v1218_v61 = vpop.f32.mrf.mxu2  ;;  %v1231_v62 = vpop.f32.mrf.mxu3 }
 0x279   :  { %v1219_v63 = vadd.f32 %v1218_v61, %v1013_v59  ;;  %v1194_v0 = vpop.f32.mrf.mxu0  ;;  %v1207_v1 = vpop.f32.mrf.mxu1 }
 0x27b   :  { %v1232_v2 = vadd.f32 %v1231_v62, %v1219_v63 }
 0x27d   :  { %v3444_v3 = vmax.f32 %v1232_v2, 0.0 }
 0x27f   :  { %1240 = vst [vmem:[%s3490_s8 + $0x40] sm:$0xff] %v3444_v3 }
 0x280   :  { %v1220_v4 = vpop.f32.mrf.mxu2  ;;  %v1233_v5 = vpop.f32.mrf.mxu3 }
 0x281   :  { %3306 = dma.done.wait [#allocation3], 12288 }
 0x282   :  { %3307 = vsyncadd [#allocation3], 4294955008  ;;  %v2603_v6 = vld [vmem:[#allocation2 + $0x150] sm:$0xf]  ;;  %v3057_v7 = vld [vmem:[#allocation2 + $0x164] sm:$0xf0] }
 0x283   :  { %v2667_v8 = vld [vmem:[#allocation2 + $0x2d0] sm:$0xf]  ;;  %v2604_v9 = vor.u32 %v3057_v7, %v2603_v6  ;;  %v3073_v10 = vld [vmem:[#allocation2 + $0x2e4] sm:$0xf0]  ;;  %v3056_v11 = vld [vmem:[#allocation2 + $0x154] sm:$0xf] }
 0x284   :  { %v2605_v12 = vld [vmem:[#allocation2 + $0x168] sm:$0xf0]  ;;  %v2668_v13 = vor.u32 %v3073_v10, %v2667_v8  ;;  %v3072_v15 = vld [vmem:[#allocation2 + $0x2d4] sm:$0xf]  ;;  %v2595_v17 = vld [vmem:[#allocation2 + $0x120] sm:$0xf] }
 0x285   :  { %v2608_v14 = vor.u32 %v3056_v11, %v2605_v12  ;;  %v2669_v16 = vld [vmem:[#allocation2 + $0x2e8] sm:$0xf0]  ;;  %1541 = vmatpush.bf16.msra.mxu0 %v2604_v9  ;;  %v3055_v19 = vld [vmem:[#allocation2 + $0x134] sm:$0xf0]  ;;  %v2659_v20 = vld [vmem:[#allocation2 + $0x2a0] sm:$0xf] }
 0x286   :  { %v2672_v18 = vor.u32 %v3072_v15, %v2669_v16  ;;  %v3071_v21 = vld [vmem:[#allocation2 + $0x2b4] sm:$0xf0]  ;;  %1554 = vmatpush.bf16.msra.mxu1 %v2668_v13  ;;  %v2596_v22 = vor.u32 %v3055_v19, %v2595_v17  ;;  %v3054_v24 = vld [vmem:[#allocation2 + $0x124] sm:$0xf]  ;;  %v2597_v25 = vld [vmem:[#allocation2 + $0x138] sm:$0xf0] }
 0x287   :  { %1567 = vmatpush.bf16.msra.mxu2 %v2608_v14  ;;  %v2660_v23 = vor.u32 %v3071_v21, %v2659_v20  ;;  %v3070_v26 = vld [vmem:[#allocation2 + $0x2a4] sm:$0xf]  ;;  %v2600_v27 = vor.u32 %v3054_v24, %v2597_v25  ;;  %v2661_v28 = vld [vmem:[#allocation2 + $0x2b8] sm:$0xf0]  ;;  %v2587_v29 = vld [vmem:[#allocation2 + $0xf0] sm:$0xf] }
 0x288   :  { %1580 = vmatpush.bf16.msra.mxu3 %v2672_v18  ;;  %v3053_v30 = vld [vmem:[#allocation2 + $0x104] sm:$0xf0]  ;;  %v2664_v31 = vor.u32 %v3070_v26, %v2661_v28  ;;  %v2651_v32 = vld [vmem:[#allocation2 + $0x270] sm:$0xf]  ;;  %v3052_v34 = vld [vmem:[#allocation2 + $0xf4] sm:$0xf] }
 0x289   :  { %v3069_v33 = vld [vmem:[#allocation2 + $0x284] sm:$0xf0]  ;;  %1542 = vmatpush.bf16.msra.mxu0 %v2596_v22  ;;  %v2588_v35 = vor.u32 %v3053_v30, %v2587_v29  ;;  %v2589_v36 = vld [vmem:[#allocation2 + $0x108] sm:$0xf0]  ;;  %v3068_v37 = vld [vmem:[#allocation2 + $0x274] sm:$0xf] }
 0x28a   :  { %v2653_v38 = vld [vmem:[#allocation2 + $0x288] sm:$0xf0]  ;;  %1555 = vmatpush.bf16.msra.mxu1 %v2660_v23  ;;  %v2652_v39 = vor.u32 %v3069_v33, %v2651_v32  ;;  %v2592_v40 = vor.u32 %v3052_v34, %v2589_v36  ;;  %v2579_v41 = vld [vmem:[#allocation2 + $0xc0] sm:$0xf]  ;;  %v3051_v42 = vld [vmem:[#allocation2 + $0xd4] sm:$0xf0] }
 0x28b   :  { %1568 = vmatpush.bf16.msra.mxu2 %v2600_v27  ;;  %v2643_v44 = vld [vmem:[#allocation2 + $0x240] sm:$0xf]  ;;  %v2656_v45 = vor.u32 %v3068_v37, %v2653_v38  ;;  %v3067_v46 = vld [vmem:[#allocation2 + $0x254] sm:$0xf0]  ;;  %v3050_v47 = vld [vmem:[#allocation2 + $0xc4] sm:$0xf]  ;;  %v2580_v52 = vor.u32 %v3051_v42, %v2579_v41 }
 0x28c   :  { %1581 = vmatpush.bf16.msra.mxu3 %v2664_v31  ;;  %v2581_v48 = vld [vmem:[#allocation2 + $0xd8] sm:$0xf0]  ;;  %v3066_v49 = vld [vmem:[#allocation2 + $0x244] sm:$0xf]  ;;  %v2644_v53 = vor.u32 %v3067_v46, %v2643_v44  ;;  %v2571_v55 = vld [vmem:[#allocation2 + $0x90] sm:$0xf] }
 0x28d   :  { %v2645_v50 = vld [vmem:[#allocation2 + $0x258] sm:$0xf0]  ;;  %1543 = vmatpush.bf16.msra.mxu0 %v2588_v35  ;;  %v2584_v54 = vor.u32 %v3050_v47, %v2581_v48  ;;  %v3049_v56 = vld [vmem:[#allocation2 + $0xa4] sm:$0xf0]  ;;  %v2635_v57 = vld [vmem:[#allocation2 + $0x210] sm:$0xf] }
 0x28e   :  { %1556 = vmatpush.bf16.msra.mxu1 %v2652_v39  ;;  %v2648_v58 = vor.u32 %v3066_v49, %v2645_v50  ;;  %v3065_v59 = vld [vmem:[#allocation2 + $0x224] sm:$0xf0]  ;;  %v3048_v61 = vld [vmem:[#allocation2 + $0x94] sm:$0xf]  ;;  %v2573_v62 = vld [vmem:[#allocation2 + $0xa8] sm:$0xf0]  ;;  %v2572_v1 = vor.u32 %v3049_v56, %v2571_v55 }
 0x28f   :  { %1569 = vmatpush.bf16.msra.mxu2 %v2592_v40  ;;  %v3064_v63 = vld [vmem:[#allocation2 + $0x214] sm:$0xf]  ;;  %v2637_v0 = vld [vmem:[#allocation2 + $0x228] sm:$0xf0]  ;;  %v2636_v2 = vor.u32 %v3065_v59, %v2635_v57  ;;  %v2576_v4 = vor.u32 %v3048_v61, %v2573_v62  ;;  %v2563_v5 = vld [vmem:[#allocation2 + $0x60] sm:$0xf] }
 0x290   :  { %1582 = vmatpush.bf16.msra.mxu3 %v2656_v45  ;;  %v3047_v6 = vld [vmem:[#allocation2 + $0x74] sm:$0xf0]  ;;  %v2627_v7 = vld [vmem:[#allocation2 + $0x1e0] sm:$0xf]  ;;  %v2640_v8 = vor.u32 %v3064_v63, %v2637_v0  ;;  %v3046_v10 = vld [vmem:[#allocation2 + $0x64] sm:$0xf]  ;;  %v1373_v63 = vpack.c.bf16 %v3423_v43, %v3423_v43 }
 0x291   :  { %1544 = vmatpush.bf16.msra.mxu0 %v2580_v52  ;;  %v3063_v9 = vld [vmem:[#allocation2 + $0x1f4] sm:$0xf0]  ;;  %v2565_v11 = vld [vmem:[#allocation2 + $0x78] sm:$0xf0]  ;;  %v3062_v12 = vld [vmem:[#allocation2 + $0x1e4] sm:$0xf]  ;;  %v2564_v14 = vor.u32 %v3047_v6, %v2563_v5 }
 0x292   :  { %1557 = vmatpush.bf16.msra.mxu1 %v2644_v53  ;;  %v2629_v13 = vld [vmem:[#allocation2 + $0x1f8] sm:$0xf0]  ;;  %v2628_v15 = vor.u32 %v3063_v9, %v2627_v7  ;;  %v2568_v16 = vor.u32 %v3046_v10, %v2565_v11  ;;  %v2555_v17 = vld [vmem:[#allocation2 + $0x30] sm:$0xf]  ;;  %v3045_v18 = vld [vmem:[#allocation2 + $0x44] sm:$0xf0] }
 0x293   :  { %1570 = vmatpush.bf16.msra.mxu2 %v2584_v54  ;;  %v2619_v19 = vld [vmem:[#allocation2 + $0x1b0] sm:$0xf]  ;;  %v2632_v20 = vor.u32 %v3062_v12, %v2629_v13  ;;  %v3061_v21 = vld [vmem:[#allocation2 + $0x1c4] sm:$0xf0]  ;;  %v3044_v22 = vld [vmem:[#allocation2 + $0x34] sm:$0xf]  ;;  %v2556_v26 = vor.u32 %v3045_v18, %v2555_v17 }
 0x294   :  { %1583 = vmatpush.bf16.msra.mxu3 %v2648_v58  ;;  %v2557_v23 = vld [vmem:[#allocation2 + $0x48] sm:$0xf0]  ;;  %v3060_v24 = vld [vmem:[#allocation2 + $0x1b4] sm:$0xf]  ;;  %v2547_v27 = vld [vmem:[#allocation2] sm:$0xf]  ;;  %v2620_v29 = vor.u32 %v3061_v21, %v2619_v19 }
 0x295   :  { %1545 = vmatpush.bf16.msra.mxu0 %v2572_v1  ;;  %v2621_v25 = vld [vmem:[#allocation2 + $0x1c8] sm:$0xf0]  ;;  %v3043_v28 = vld [vmem:[#allocation2 + $0x14] sm:$0xf0]  ;;  %v2560_v30 = vor.u32 %v3044_v22, %v2557_v23  ;;  %v2611_v31 = vld [vmem:[#allocation2 + $0x180] sm:$0xf] }
 0x296   :  { %1558 = vmatpush.bf16.msra.mxu1 %v2636_v2  ;;  %v3059_v32 = vld [vmem:[#allocation2 + $0x194] sm:$0xf0]  ;;  %v3042_v33 = vld [vmem:[#allocation2 + $0x4] sm:$0xf]  ;;  %v2624_v34 = vor.u32 %v3060_v24, %v2621_v25  ;;  %v2549_v35 = vld [vmem:[#allocation2 + $0x18] sm:$0xf0]  ;;  %v2548_v41 = vor.u32 %v3043_v28, %v2547_v27  ;;  %v1374_v2 = vpack.c.bf16 %v3432_v51, %v3432_v51 }
 0x297   :  { %1571 = vmatpush.bf16.msra.mxu2 %v2576_v4  ;;  %v3058_v36 = vld [vmem:[#allocation2 + $0x184] sm:$0xf]  ;;  %v2613_v37 = vld [vmem:[#allocation2 + $0x198] sm:$0xf0]  ;;  %v2731_v38 = vld [vmem:[#allocation2 + $0x158] sm:$0xf]  ;;  %v2612_v46 = vor.u32 %v3059_v32, %v2611_v31  ;;  %v2552_v47 = vor.u32 %v3042_v33, %v2549_v35 }
 0x298   :  { %1584 = vmatpush.bf16.msra.mxu3 %v2640_v8  ;;  %v3089_v39 = vld [vmem:[#allocation2 + $0x16c] sm:$0xf0]  ;;  %v2795_v40 = vld [vmem:[#allocation2 + $0x2d8] sm:$0xf]  ;;  %v3088_v44 = vld [vmem:[#allocation2 + $0x15c] sm:$0xf]  ;;  %v2616_v50 = vor.u32 %v3058_v36, %v2613_v37 }
 0x299   :  { %1546 = vmatpush.bf16.msra.mxu0 %v2564_v14  ;;  %v3105_v42 = vld [vmem:[#allocation2 + $0x2ec] sm:$0xf0]  ;;  %v2733_v45 = vld [vmem:[#allocation2 + $0x170] sm:$0xf0]  ;;  %v3104_v48 = vld [vmem:[#allocation2 + $0x2dc] sm:$0xf]  ;;  %v2732_v52 = vor.u32 %v3089_v39, %v2731_v38 }
 0x29a   :  { %1559 = vmatpush.bf16.msra.mxu1 %v2628_v15  ;;  %v2797_v49 = vld [vmem:[#allocation2 + $0x2f0] sm:$0xf0]  ;;  %v2796_v53 = vor.u32 %v3105_v42, %v2795_v40  ;;  %v2736_v54 = vor.u32 %v3088_v44, %v2733_v45  ;;  %v2723_v55 = vld [vmem:[#allocation2 + $0x128] sm:$0xf]  ;;  %v3087_v56 = vld [vmem:[#allocation2 + $0x13c] sm:$0xf0] }
 0x29b   :  { %1572 = vmatpush.bf16.msra.mxu2 %v2568_v16  ;;  %v2787_v57 = vld [vmem:[#allocation2 + $0x2a8] sm:$0xf]  ;;  %v2800_v58 = vor.u32 %v3104_v48, %v2797_v49  ;;  %v3103_v59 = vld [vmem:[#allocation2 + $0x2bc] sm:$0xf0]  ;;  %v3086_v61 = vld [vmem:[#allocation2 + $0x12c] sm:$0xf]  ;;  %v2724_v4 = vor.u32 %v3087_v56, %v2723_v55 }
 0x29c   :  { %1585 = vmatpush.bf16.msra.mxu3 %v2632_v20  ;;  %v2725_v62 = vld [vmem:[#allocation2 + $0x140] sm:$0xf0]  ;;  %v3102_v0 = vld [vmem:[#allocation2 + $0x2ac] sm:$0xf]  ;;  %v2788_v5 = vor.u32 %v3103_v59, %v2787_v57  ;;  %v2715_v7 = vld [vmem:[#allocation2 + $0xf8] sm:$0xf] }
 0x29d   :  { %1547 = vmatpush.bf16.msra.mxu0 %v2556_v26  ;;  %v2789_v1 = vld [vmem:[#allocation2 + $0x2c0] sm:$0xf0]  ;;  %v2728_v6 = vor.u32 %v3086_v61, %v2725_v62  ;;  %v3085_v8 = vld [vmem:[#allocation2 + $0x10c] sm:$0xf0]  ;;  %v2779_v9 = vld [vmem:[#allocation2 + $0x278] sm:$0xf] }
 0x29e   :  { %1560 = vmatpush.bf16.msra.mxu1 %v2620_v29  ;;  %v2792_v10 = vor.u32 %v3102_v0, %v2789_v1  ;;  %v3101_v43 = vld [vmem:[#allocation2 + $0x28c] sm:$0xf0]  ;;  %v3084_v11 = vld [vmem:[#allocation2 + $0xfc] sm:$0xf]  ;;  %v2717_v12 = vld [vmem:[#allocation2 + $0x110] sm:$0xf0]  ;;  %v2716_v51 = vor.u32 %v3085_v8, %v2715_v7 }
 0x29f   :  { %1573 = vmatpush.bf16.msra.mxu2 %v2560_v30  ;;  %v3100_v13 = vld [vmem:[#allocation2 + $0x27c] sm:$0xf]  ;;  %v2781_v14 = vld [vmem:[#allocation2 + $0x290] sm:$0xf0]  ;;  %v2780_v15 = vor.u32 %v3101_v43, %v2779_v9  ;;  %v2720_v16 = vor.u32 %v3084_v11, %v2717_v12  ;;  %v2707_v17 = vld [vmem:[#allocation2 + $0xc8] sm:$0xf] }
 0x2a0   :  { %1586 = vmatpush.bf16.msra.mxu3 %v2624_v34  ;;  %v3083_v18 = vld [vmem:[#allocation2 + $0xdc] sm:$0xf0]  ;;  %v2771_v19 = vld [vmem:[#allocation2 + $0x248] sm:$0xf]  ;;  %v2784_v20 = vor.u32 %v3100_v13, %v2781_v14  ;;  %v3082_v22 = vld [vmem:[#allocation2 + $0xcc] sm:$0xf] }
 0x2a1   :  { %1548 = vmatpush.bf16.msra.mxu0 %v2548_v41  ;;  %v3099_v21 = vld [vmem:[#allocation2 + $0x25c] sm:$0xf0]  ;;  %v2709_v23 = vld [vmem:[#allocation2 + $0xe0] sm:$0xf0]  ;;  %v3098_v24 = vld [vmem:[#allocation2 + $0x24c] sm:$0xf]  ;;  %v2708_v26 = vor.u32 %v3083_v18, %v2707_v17 }
 0x2a2   :  { %1561 = vmatpush.bf16.msra.mxu1 %v2612_v46  ;;  %v2773_v25 = vld [vmem:[#allocation2 + $0x260] sm:$0xf0]  ;;  %v2772_v27 = vor.u32 %v3099_v21, %v2771_v19  ;;  %v2712_v28 = vor.u32 %v3082_v22, %v2709_v23  ;;  %v2699_v29 = vld [vmem:[#allocation2 + $0x98] sm:$0xf]  ;;  %v3081_v30 = vld [vmem:[#allocation2 + $0xac] sm:$0xf0]  ;;  %v1595_v23 = vpack.c.bf16 %v3438_v60, %v3438_v60 }
 0x2a3   :  { %1574 = vmatpush.bf16.msra.mxu2 %v2552_v47  ;;  %v2763_v31 = vld [vmem:[#allocation2 + $0x218] sm:$0xf]  ;;  %v2776_v32 = vor.u32 %v3098_v24, %v2773_v25  ;;  %v3097_v33 = vld [vmem:[#allocation2 + $0x22c] sm:$0xf0]  ;;  %v3080_v34 = vld [vmem:[#allocation2 + $0x9c] sm:$0xf]  ;;  %v2700_v38 = vor.u32 %v3081_v30, %v2699_v29 }
 0x2a4   :  { %1587 = vmatpush.bf16.msra.mxu3 %v2616_v50  ;;  %1549 = vmatmul.bf16.vlgmr.msra.gmra.mxu0 %v1373_v63  ;;  %v2701_v35 = vld [vmem:[#allocation2 + $0xb0] sm:$0xf0]  ;;  %v3096_v36 = vld [vmem:[#allocation2 + $0x21c] sm:$0xf]  ;;  %v2764_v39 = vor.u32 %v3097_v33, %v2763_v31  ;;  %v2691_v41 = vld [vmem:[#allocation2 + $0x68] sm:$0xf] }
 0x2a5   :  { %1763 = vmatpush.bf16.msrb.mxu0 %v2732_v52  ;;  %1562 = vmatmul.bf16.vlgmr.msra.gmra.mxu1 %v1374_v2  ;;  %v2765_v37 = vld [vmem:[#allocation2 + $0x230] sm:$0xf0]  ;;  %v2704_v40 = vor.u32 %v3080_v34, %v2701_v35  ;;  %v3079_v42 = vld [vmem:[#allocation2 + $0x7c] sm:$0xf0]  ;;  %v2755_v44 = vld [vmem:[#allocation2 + $0x1e8] sm:$0xf] }
 0x2a6   :  { %1776 = vmatpush.bf16.msrb.mxu1 %v2796_v53  ;;  %1575 = vmatmul.bf16.vlgmr.msra.gmra.mxu2 %v1373_v63  ;;  %v2768_v45 = vor.u32 %v3096_v36, %v2765_v37  ;;  %v3095_v46 = vld [vmem:[#allocation2 + $0x1fc] sm:$0xf0]  ;;  %v3078_v47 = vld [vmem:[#allocation2 + $0x6c] sm:$0xf]  ;;  %v2693_v48 = vld [vmem:[#allocation2 + $0x80] sm:$0xf0]  ;;  %v2692_v52 = vor.u32 %v3079_v42, %v2691_v41 }
 0x2a7   :  { %1789 = vmatpush.bf16.msrb.mxu2 %v2736_v54  ;;  %1588 = vmatmul.bf16.vlgmr.msra.gmra.mxu3 %v1374_v2  ;;  %v3094_v49 = vld [vmem:[#allocation2 + $0x1ec] sm:$0xf]  ;;  %v2757_v50 = vld [vmem:[#allocation2 + $0x200] sm:$0xf0]  ;;  %v2683_v53 = vld [vmem:[#allocation2 + $0x38] sm:$0xf]  ;;  %v2756_v54 = vor.u32 %v3095_v46, %v2755_v44  ;;  %v2696_v55 = vor.u32 %v3078_v47, %v2693_v48 }
 0x2a8   :  { %1802 = vmatpush.bf16.msrb.mxu3 %v2800_v58  ;;  %v3077_v56 = vld [vmem:[#allocation2 + $0x4c] sm:$0xf0]  ;;  %v2747_v57 = vld [vmem:[#allocation2 + $0x1b8] sm:$0xf]  ;;  %v2760_v58 = vor.u32 %v3094_v49, %v2757_v50  ;;  %v3076_v61 = vld [vmem:[#allocation2 + $0x3c] sm:$0xf] }
 0x2a9   :  { %1764 = vmatpush.bf16.msrb.mxu0 %v2724_v4  ;;  %v3093_v59 = vld [vmem:[#allocation2 + $0x1cc] sm:$0xf0]  ;;  %v2685_v62 = vld [vmem:[#allocation2 + $0x50] sm:$0xf0]  ;;  %v3092_v63 = vld [vmem:[#allocation2 + $0x1bc] sm:$0xf]  ;;  %v2684_v1 = vor.u32 %v3077_v56, %v2683_v53 }
 0x2aa   :  { %1777 = vmatpush.bf16.msrb.mxu1 %v2788_v5  ;;  %v2749_v0 = vld [vmem:[#allocation2 + $0x1d0] sm:$0xf0]  ;;  %v2675_v2 = vld [vmem:[#allocation2 + $0x8] sm:$0xf]  ;;  %v2748_v4 = vor.u32 %v3093_v59, %v2747_v57  ;;  %v2688_v5 = vor.u32 %v3076_v61, %v2685_v62  ;;  %v3091_v8 = vld [vmem:[#allocation2 + $0x19c] sm:$0xf0] }
 0x2ab   :  { %1790 = vmatpush.bf16.msrb.mxu2 %v2728_v6  ;;  %v3075_v6 = vld [vmem:[#allocation2 + $0x1c] sm:$0xf0]  ;;  %v2739_v7 = vld [vmem:[#allocation2 + $0x188] sm:$0xf]  ;;  %v2752_v9 = vor.u32 %v3092_v63, %v2749_v0  ;;  %v2677_v43 = vld [vmem:[#allocation2 + $0x20] sm:$0xf0] }
 0x2ac   :  { %1803 = vmatpush.bf16.msrb.mxu3 %v2792_v10  ;;  %v3074_v10 = vld [vmem:[#allocation2 + $0xc] sm:$0xf]  ;;  %v2741_v12 = vld [vmem:[#allocation2 + $0x1a0] sm:$0xf0]  ;;  %v2895_v13 = vld [vmem:[#allocation2 + $0x160] sm:$0xf]  ;;  %v2740_v17 = vor.u32 %v3091_v8, %v2739_v7 }
 0x2ad   :  { %1765 = vmatpush.bf16.msrb.mxu0 %v2716_v51  ;;  %v3090_v11 = vld [vmem:[#allocation2 + $0x18c] sm:$0xf]  ;;  %v3113_v14 = vld [vmem:[#allocation2 + $0x174] sm:$0xf0]  ;;  %v2676_v51 = vor.u32 %v3075_v6, %v2675_v2  ;;  %v2680_v18 = vor.u32 %v3074_v10, %v2677_v43  ;;  %v2831_v21 = vld [vmem:[#allocation2 + $0x164] sm:$0xf] }
 0x2ae   :  { %1778 = vmatpush.bf16.msrb.mxu1 %v2780_v15  ;;  %v2927_v15 = vld [vmem:[#allocation2 + $0x2e0] sm:$0xf]  ;;  %v2744_v19 = vor.u32 %v3090_v11, %v2741_v12  ;;  %v3129_v22 = vld [vmem:[#allocation2 + $0x178] sm:$0xf0]  ;;  %v2891_v25 = vld [vmem:[#allocation2 + $0x130] sm:$0xf] }
 0x2af   :  { %1791 = vmatpush.bf16.msrb.mxu2 %v2720_v16  ;;  %v3121_v16 = vld [vmem:[#allocation2 + $0x2f4] sm:$0xf0]  ;;  %v3120_v29 = vld [vmem:[#allocation2 + $0x2c4] sm:$0xf0]  ;;  %v2832_v30 = vor.u32 %v3129_v22, %v2831_v21  ;;  %v2887_v33 = vld [vmem:[#allocation2 + $0x100] sm:$0xf] }
 0x2b0   :  { %1804 = vmatpush.bf16.msrb.mxu3 %v2784_v20  ;;  %v2896_v20 = vor.u32 %v3113_v14, %v2895_v13  ;;  %v2928_v24 = vor.u32 %v3121_v16, %v2927_v15  ;;  %v3111_v60 = vld [vmem:[#allocation2 + $0x114] sm:$0xf0]  ;;  %v2919_v34 = vld [vmem:[#allocation2 + $0x280] sm:$0xf]  ;;  %v2883_v37 = vld [vmem:[#allocation2 + $0xd0] sm:$0xf] }
 0x2b1   :  { %1766 = vmatpush.bf16.msrb.mxu0 %v2708_v26  ;;  %v3112_v26 = vld [vmem:[#allocation2 + $0x144] sm:$0xf0]  ;;  %v3119_v35 = vld [vmem:[#allocation2 + $0x294] sm:$0xf0]  ;;  %v2879_v44 = vld [vmem:[#allocation2 + $0xa0] sm:$0xf] }
 0x2b2   :  { %1779 = vmatpush.bf16.msrb.mxu1 %v2772_v27  ;;  %v1596_v27 = vpack.c.bf16 %v3444_v3, %v3444_v3  ;;  %v2892_v31 = vor.u32 %v3112_v26, %v2891_v25  ;;  %v2888_v3 = vor.u32 %v3111_v60, %v2887_v33  ;;  %v2920_v36 = vor.u32 %v3119_v35, %v2919_v34  ;;  %v2911_v46 = vld [vmem:[#allocation2 + $0x220] sm:$0xf]  ;;  %v3117_v47 = vld [vmem:[#allocation2 + $0x234] sm:$0xf0]  ;;  %v2875_v50 = vld [vmem:[#allocation2 + $0x70] sm:$0xf] }
 0x2b3   :  { %1792 = vmatpush.bf16.msrb.mxu2 %v2712_v28  ;;  %v2923_v28 = vld [vmem:[#allocation2 + $0x2b0] sm:$0xf]  ;;  %v2912_v49 = vor.u32 %v3117_v47, %v2911_v46  ;;  %v2827_v57 = vld [vmem:[#allocation2 + $0x134] sm:$0xf]  ;;  %v2863_v61 = vld [vmem:[#allocation2 + $0x2e4] sm:$0xf] }
 0x2b4   :  { %1805 = vmatpush.bf16.msrb.mxu3 %v2776_v32  ;;  %v2924_v32 = vor.u32 %v3120_v29, %v2923_v28  ;;  %v2907_v53 = vld [vmem:[#allocation2 + $0x1f0] sm:$0xf]  ;;  %v3137_v62 = vld [vmem:[#allocation2 + $0x2f8] sm:$0xf0]  ;;  %v2871_v63 = vld [vmem:[#allocation2 + $0x40] sm:$0xf] }
 0x2b5   :  { %1767 = vmatpush.bf16.msrb.mxu0 %v2700_v38  ;;  %v3110_v38 = vld [vmem:[#allocation2 + $0xe4] sm:$0xf0]  ;;  %v2864_v0 = vor.u32 %v3137_v62, %v2863_v61  ;;  %v2903_v2 = vld [vmem:[#allocation2 + $0x1c0] sm:$0xf]  ;;  %v2823_v7 = vld [vmem:[#allocation2 + $0x104] sm:$0xf] }
 0x2b6   :  { %1780 = vmatpush.bf16.msrb.mxu1 %v2764_v39  ;;  %v2915_v39 = vld [vmem:[#allocation2 + $0x250] sm:$0xf]  ;;  %v2884_v41 = vor.u32 %v3110_v38, %v2883_v37  ;;  %v3127_v8 = vld [vmem:[#allocation2 + $0x118] sm:$0xf0]  ;;  %v3136_v43 = vld [vmem:[#allocation2 + $0x2c8] sm:$0xf0] }
 0x2b7   :  { %1793 = vmatpush.bf16.msrb.mxu2 %v2704_v40  ;;  %v3118_v40 = vld [vmem:[#allocation2 + $0x264] sm:$0xf0]  ;;  %v2824_v10 = vor.u32 %v3127_v8, %v2823_v7  ;;  %v2867_v11 = vld [vmem:[#allocation2 + $0x10] sm:$0xf]  ;;  %v2819_v16 = vld [vmem:[#allocation2 + $0xd4] sm:$0xf] }
 0x2b8   :  { %1806 = vmatpush.bf16.msrb.mxu3 %v2768_v45  ;;  %v2916_v42 = vor.u32 %v3118_v40, %v2915_v39  ;;  %v3109_v45 = vld [vmem:[#allocation2 + $0xb4] sm:$0xf0]  ;;  %v3106_v12 = vld [vmem:[#allocation2 + $0x24] sm:$0xf0]  ;;  %v2815_v22 = vld [vmem:[#allocation2 + $0xa4] sm:$0xf] }
 0x2b9   :  { %1768 = vmatpush.bf16.msrb.mxu0 %v2692_v52  ;;  %v2880_v48 = vor.u32 %v3109_v45, %v2879_v44  ;;  %v3108_v52 = vld [vmem:[#allocation2 + $0x84] sm:$0xf0]  ;;  %v2868_v14 = vor.u32 %v3106_v12, %v2867_v11  ;;  %v2851_v25 = vld [vmem:[#allocation2 + $0x254] sm:$0xf]  ;;  %v3134_v26 = vld [vmem:[#allocation2 + $0x268] sm:$0xf0] }
 0x2ba   :  { %1781 = vmatpush.bf16.msrb.mxu1 %v2756_v54  ;;  %v3116_v54 = vld [vmem:[#allocation2 + $0x204] sm:$0xf0]  ;;  %v2811_v28 = vld [vmem:[#allocation2 + $0x74] sm:$0xf]  ;;  %v3124_v29 = vld [vmem:[#allocation2 + $0x88] sm:$0xf0] }
 0x2bb   :  { %1794 = vmatpush.bf16.msrb.mxu2 %v2696_v55  ;;  %v2876_v55 = vor.u32 %v3108_v52, %v2875_v50  ;;  %v2908_v56 = vor.u32 %v3116_v54, %v2907_v53  ;;  %v3114_v15 = vld [vmem:[#allocation2 + $0x1a4] sm:$0xf0]  ;;  %v2847_v33 = vld [vmem:[#allocation2 + $0x224] sm:$0xf]  ;;  %v3133_v60 = vld [vmem:[#allocation2 + $0x238] sm:$0xf0] }
 0x2bc   :  { %1807 = vmatpush.bf16.msrb.mxu3 %v2760_v58  ;;  %v3128_v58 = vld [vmem:[#allocation2 + $0x148] sm:$0xf0]  ;;  %v2848_v34 = vor.u32 %v3133_v60, %v2847_v33  ;;  %v2843_v38 = vld [vmem:[#allocation2 + $0x1f4] sm:$0xf]  ;;  %v2839_v50 = vld [vmem:[#allocation2 + $0x1c4] sm:$0xf] }
 0x2bd   :  { %1769 = vmatpush.bf16.msrb.mxu0 %v2684_v1  ;;  %v2828_v59 = vor.u32 %v3128_v58, %v2827_v57  ;;  %v3107_v1 = vld [vmem:[#allocation2 + $0x54] sm:$0xf0]  ;;  %v3132_v39 = vld [vmem:[#allocation2 + $0x208] sm:$0xf0]  ;;  %v2803_v45 = vld [vmem:[#allocation2 + $0x14] sm:$0xf] }
 0x2be   :  { %1782 = vmatpush.bf16.msrb.mxu1 %v2748_v4  ;;  %v3115_v4 = vld [vmem:[#allocation2 + $0x1d4] sm:$0xf0]  ;;  %v3122_v46 = vld [vmem:[#allocation2 + $0x28] sm:$0xf0]  ;;  %v3131_v52 = vld [vmem:[#allocation2 + $0x1d8] sm:$0xf0] }
 0x2bf   :  { %1795 = vmatpush.bf16.msrb.mxu2 %v2688_v5  ;;  %v2872_v5 = vor.u32 %v3107_v1, %v2871_v63  ;;  %v2904_v6 = vor.u32 %v3115_v4, %v2903_v2  ;;  %v2840_v53 = vor.u32 %v3131_v52, %v2839_v50  ;;  %v3130_v61 = vld [vmem:[#allocation2 + $0x1a8] sm:$0xf0]  ;;  %v1597_v7 = vld [vmem:[%s3488_s6 + $0xd] sm:$0x3]  ;;  %v3155_v33 = vld [vmem:[%s3488_s6 + $0xf] ss:$0 sm:$0xff] }
 0x2c0   :  { %1808 = vmatpush.bf16.msrb.mxu3 %v2752_v9  ;;  %v2859_v9 = vld [vmem:[#allocation2 + $0x2b4] sm:$0xf]  ;;  %v1599_v8 = vperm.slane %v1597_v7, 0  ;;  %v1600_v12 = vperm.slane %v1597_v7, 1 }
 0x2c1   :  { %1770 = vmatpush.bf16.msrb.mxu0 %v2676_v51  ;;  %v2860_v13 = vor.u32 %v3136_v43, %v2859_v9  ;;  %v2899_v51 = vld [vmem:[#allocation2 + $0x190] sm:$0xf] }
 0x2c2   :  { %1783 = vmatpush.bf16.msrb.mxu1 %v2740_v17  ;;  %v2900_v17 = vor.u32 %v3114_v15, %v2899_v51 }
 0x2c3   :  { %1796 = vmatpush.bf16.msrb.mxu2 %v2680_v18  ;;  %v3126_v18 = vld [vmem:[#allocation2 + $0xe8] sm:$0xf0] }
 0x2c4   :  { %1809 = vmatpush.bf16.msrb.mxu3 %v2744_v19  ;;  %1771 = vmatmul.bf16.vlgmr.msrb.gmra.mxu0 %v1595_v23  ;;  %v2855_v19 = vld [vmem:[#allocation2 + $0x284] sm:$0xf]  ;;  %v2820_v21 = vor.u32 %v3126_v18, %v2819_v16 }
 0x2c5   :  { %1784 = vmatmul.bf16.vlgmr.msrb.gmra.mxu1 %v1596_v27  ;;  %1921 = vmatpush.bf16.msra.mxu0 %v2832_v30  ;;  %v2852_v30 = vor.u32 %v3134_v26, %v2851_v25 }
 0x2c6   :  { %1797 = vmatmul.bf16.vlgmr.msrb.gmra.mxu2 %v1595_v23  ;;  %1934 = vmatpush.bf16.msra.mxu1 %v2864_v0  ;;  %v3125_v23 = vld [vmem:[#allocation2 + $0xb8] sm:$0xf0] }
 0x2c7   :  { %2043 = vmatpush.bf16.msra.mxu2 %v2896_v20  ;;  %1810 = vmatmul.bf16.vlgmr.msrb.gmra.mxu3 %v1596_v27  ;;  %v3135_v20 = vld [vmem:[#allocation2 + $0x298] sm:$0xf0]  ;;  %v2816_v27 = vor.u32 %v3125_v23, %v2815_v22 }
 0x2c8   :  { %2056 = vmatpush.bf16.msra.mxu3 %v2928_v24  ;;  %v2856_v24 = vor.u32 %v3135_v20, %v2855_v19 }
 0x2c9   :  { %1922 = vmatpush.bf16.msra.mxu0 %v2828_v59  ;;  %v2835_v59 = vld [vmem:[#allocation2 + $0x194] sm:$0xf] }
 0x2ca   :  { %1935 = vmatpush.bf16.msra.mxu1 %v2860_v13  ;;  %v2836_v0 = vor.u32 %v3130_v61, %v2835_v59 }
 0x2cb   :  { %2044 = vmatpush.bf16.msra.mxu2 %v2892_v31  ;;  %v2812_v31 = vor.u32 %v3124_v29, %v2811_v28 }
 0x2cc   :  { %2057 = vmatpush.bf16.msra.mxu3 %v2924_v32  ;;  %v1375_v32 = vld [vmem:[%s3488_s6 + $0xb] sm:$0x3] }
 0x2cd   :  { %1923 = vmatpush.bf16.msra.mxu0 %v2824_v10  ;;  %v1377_v35 = vperm.slane %v1375_v32, 0  ;;  %v1378_v47 = vperm.slane %v1375_v32, 1 }
 0x2ce   :  { %1936 = vmatpush.bf16.msra.mxu1 %v2856_v24 }
 0x2cf   :  { %2045 = vmatpush.bf16.msra.mxu2 %v2888_v3  ;;  %v2807_v3 = vld [vmem:[#allocation2 + $0x44] sm:$0xf] }
 0x2d0   :  { %2058 = vmatpush.bf16.msra.mxu3 %v2920_v36  ;;  %v3123_v36 = vld [vmem:[#allocation2 + $0x58] sm:$0xf0] }
 0x2d1   :  { %1924 = vmatpush.bf16.msra.mxu0 %v2820_v21  ;;  %v2808_v37 = vor.u32 %v3123_v36, %v2807_v3 }
 0x2d2   :  { %1937 = vmatpush.bf16.msra.mxu1 %v2852_v30 }
 0x2d3   :  { %2046 = vmatpush.bf16.msra.mxu2 %v2884_v41  ;;  %v2844_v41 = vor.u32 %v3132_v39, %v2843_v38 }
 0x2d4   :  { %2059 = vmatpush.bf16.msra.mxu3 %v2916_v42 }
 0x2d5   :  { %1925 = vmatpush.bf16.msra.mxu0 %v2816_v27 }
 0x2d6   :  { %1938 = vmatpush.bf16.msra.mxu1 %v2848_v34 }
 0x2d7   :  { %2047 = vmatpush.bf16.msra.mxu2 %v2880_v48  ;;  %v2804_v48 = vor.u32 %v3122_v46, %v2803_v45 }
 0x2d8   :  { %2060 = vmatpush.bf16.msra.mxu3 %v2912_v49 }
 0x2d9   :  { %1926 = vmatpush.bf16.msra.mxu0 %v2812_v31 }
 0x2da   :  { %1939 = vmatpush.bf16.msra.mxu1 %v2844_v41 }
 0x2db   :  { %2048 = vmatpush.bf16.msra.mxu2 %v2876_v55 }
 0x2dc   :  { %2061 = vmatpush.bf16.msra.mxu3 %v2908_v56 }
 0x2dd   :  { %1927 = vmatpush.bf16.msra.mxu0 %v2808_v37 }
 0x2de   :  { %1940 = vmatpush.bf16.msra.mxu1 %v2840_v53 }
 0x2df   :  { %2049 = vmatpush.bf16.msra.mxu2 %v2872_v5 }
 0x2e0   :  { %2062 = vmatpush.bf16.msra.mxu3 %v2904_v6 }
 0x2e1   :  { %1928 = vmatpush.bf16.msra.mxu0 %v2804_v48 }
 0x2e2   :  { %1941 = vmatpush.bf16.msra.mxu1 %v2836_v0 }
 0x2e3   :  { %2050 = vmatpush.bf16.msra.mxu2 %v2868_v14 }
 0x2e4   :  { %2063 = vmatpush.bf16.msra.mxu3 %v2900_v17 }
 0x321   :  { %v1550_v40 = vpop.f32.mrf.mxu0 }
 0x322   :  { %v1551_v42 = vadd.f32 %v1550_v40, %v1377_v35  ;;  %v1563_v44 = vpop.f32.mrf.mxu1 }
 0x324   :  { %v1564_v49 = vadd.f32 %v1563_v44, %v1551_v42 }
 0x326   :  { %v1593_v55 = vmax.f32 %v1564_v49, 0.0 }
 0x328   :  { %1817 = vst [vmem:[%s3490_s8 + $0x48] sm:$0xff] %v1593_v55  ;;  %v1821_v58 = vpack.c.bf16 %v1593_v55, %v1593_v55 }
 0x329   :  { %v1576_v54 = vpop.f32.mrf.mxu2  ;;  %v1552_v63 = vpop.f32.mrf.mxu0 }
 0x32a   :  { %v1577_v56 = vadd.f32 %v1576_v54, %v1378_v47  ;;  %v1589_v57 = vpop.f32.mrf.mxu3  ;;  %2051 = vmatmul.bf16.vlgmr.msra.gmra.mxu2 %v1821_v58  ;;  %v1565_v1 = vpop.f32.mrf.mxu1 }
 0x32c   :  { %v1590_v62 = vadd.f32 %v1589_v57, %v1577_v56 }
 0x32e   :  { %v1594_v2 = vmax.f32 %v1590_v62, 0.0 }
 0x330   :  { %1818 = vst [vmem:[%s3490_s8 + $0x50] sm:$0xff] %v1594_v2  ;;  %v1822_v4 = vpack.c.bf16 %v1594_v2, %v1594_v2 }
 0x331   :  { %v1578_v5 = vpop.f32.mrf.mxu2 }
 0x332   :  { %2064 = vmatmul.bf16.vlgmr.msra.gmra.mxu3 %v1822_v4  ;;  %v1591_v6 = vpop.f32.mrf.mxu3 }
 0x341   :  { %v1772_v9 = vpop.f32.mrf.mxu0 }
 0x342   :  { %v1773_v10 = vadd.f32 %v1772_v9, %v1599_v8  ;;  %v1785_v43 = vpop.f32.mrf.mxu1 }
 0x344   :  { %v1786_v11 = vadd.f32 %v1785_v43, %v1773_v10 }
 0x346   :  { %v1815_v13 = vmax.f32 %v1786_v11, 0.0 }
 0x348   :  { %1819 = vst [vmem:[%s3490_s8 + $0x58] sm:$0xff] %v1815_v13  ;;  %v1823_v14 = vpack.c.bf16 %v1815_v13, %v1815_v13 }
 0x349   :  { %v1798_v51 = vpop.f32.mrf.mxu2  ;;  %v1774_v17 = vpop.f32.mrf.mxu0 }
 0x34a   :  { %v1799_v15 = vadd.f32 %v1798_v51, %v1600_v12  ;;  %v1811_v16 = vpop.f32.mrf.mxu3  ;;  %v1787_v18 = vpop.f32.mrf.mxu1  ;;  %1929 = vmatmul.bf16.vlgmr.msra.gmra.mxu0 %v1823_v14 }
 0x34c   :  { %v1812_v19 = vadd.f32 %v1811_v16, %v1799_v15 }
 0x34e   :  { %v1816_v20 = vmax.f32 %v1812_v19, 0.0 }
 0x350   :  { %1820 = vst [vmem:[%s3490_s8 + $0x60] sm:$0xff] %v1816_v20  ;;  %v1824_v21 = vpack.c.bf16 %v1816_v20, %v1816_v20 }
 0x351   :  { %v1800_v22 = vpop.f32.mrf.mxu2 }
 0x352   :  { %v1813_v23 = vpop.f32.mrf.mxu3  ;;  %1942 = vmatmul.bf16.vlgmr.msra.gmra.mxu1 %v1824_v21 }
 0x3ad   :  { %v2052_v24 = vpop.f32.mrf.mxu2 }
 0x3b5   :  { %v2065_v25 = vpop.f32.mrf.mxu3  ;;  %v2054_v26 = vpop.f32.mrf.mxu2 }
 0x3bd   :  { %v2067_v27 = vpop.f32.mrf.mxu3 }
 0x3c7   :  { %v1930_v28 = vpop.f32.mrf.mxu0 }
 0x3cf   :  { %v1943_v29 = vpop.f32.mrf.mxu1  ;;  %v1932_v31 = vpop.f32.mrf.mxu0 }
 0x3d0   :  { %v1944_v30 = vadd.f32 %v1943_v29, %v1930_v28 }
 0x3d2   :  { %v2053_v32 = vadd.f32 %v2052_v24, %v1944_v30 }
 0x3d4   :  { %v2066_v60 = vadd.f32 %v2065_v25, %v2053_v32 }
 0x3d6   :  { %v2073_v34 = vadd.f32 %v3155_v33, %v2066_v60 }
 0x3d7   :  { %v1945_v35 = vpop.f32.mrf.mxu1 }
 0x3d8   :  { %2074 = vst [vmem:[%s3490_s8 + $0x68] sm:$0xff] %v2073_v34 }
 0x3d9   :  { %2079 = vsyncpa [#allocation5], 1 }
 0x3da   :  { %2080 = vsyncpa [#allocation7], 1 }
 0x3db   :  { %2081 = vsyncpa [#allocation10], 1 }
 0x3dc   :  { %2082 = vsyncmov [#allocation3] }
 0x3df   :  { %s2083_s28 = vpop.sfrf %2082 }
 0x3e0   :  { %p2929_p0 = scmp.ne.s32.totalorder %s2083_s28, 0 }
 0x3e2   :  { %2087 = shalt.err (%p2929_p0)  }

</bundles_post_ra>
